<compile_context>
chip_gen: v6e
topology: v6e:2x2x1
jax: 0.10.0
libtpu: 0.0.40
codegen_flags: <defaults>
</compile_context>

<pallas_src>
import functools

import jax
import jax.numpy as jnp
from jax.experimental import pallas as pl
from jax.experimental.pallas import tpu as pltpu

NUM_ROUTING_ITERATIONS = 3


def _route_softmax(logits, approx):
    # softmax over route nodes (the lane axis).
    m = jnp.max(logits, axis=-1, keepdims=True)
    e = jnp.exp(logits - m)
    return e * pl.reciprocal(jnp.sum(e, axis=-1, keepdims=True), approx=approx)


def _squash(s, axis, approx):
    # scale * s / sqrt(||s||^2)  ==  s * sqrt(||s||^2) / (1 + ||s||^2)
    # (NaN at ||s|| == 0, same as the reference's 0/0 -- parity kept.)
    sq = jnp.sum(s * s, axis=axis, keepdims=True)
    return s * (sq * jax.lax.rsqrt(sq)) * pl.reciprocal(1.0 + sq, approx=approx)


def capsule_routing_kernel(x_ref, w_ref, o_ref, *, num_iterations, approx_recip):
    # x_ref: [I, B, R]     (x pre-transposed; x_ref[i] is a leading-index pick)
    # w_ref: [I, C, O, R]  (weights pre-transposed; w_ref[i] likewise)
    # o_ref: [C*B, O]      (lane-dense 2-D output block)
    I, B, R = x_ref.shape
    _, C, O, _ = w_ref.shape
    CB = C * B

    # priors[c,b,o,r] = sum_i x[b,r,i] * w[c,r,i,o], as an FMA loop over the
    # tiny contraction axis I.  Every step is a pure leading-index tile pick;
    # broadcasts are along leading/sublane axes only (R stays in lanes), so no
    # cross-lane extracts are generated and no [R,I,O] intermediate exists.
    priors4 = x_ref[0][None, :, None, :] * w_ref[0][:, None, :, :]   # [C,B,O,R]
    for i in range(1, I):
        priors4 = priors4 + x_ref[i][None, :, None, :] * w_ref[i][:, None, :, :]
    priors = priors4.reshape(CB, O, R)       # collapse leading dims (layout no-op)

    # Routing logits are constant along O in the reference (delta has a
    # keepdim-1 last axis), so carry only a lane-dense [CB, 1, R] slice.
    logits = jnp.zeros((CB, 1, R), jnp.float32)

    # Iterations that feed delta (all but the last), statically unrolled.
    for _ in range(num_iterations - 1):
        probs = _route_softmax(logits, approx_recip)                  # [CB,1,R]
        s = jnp.sum(probs * priors, axis=-1, keepdims=True)           # [CB,O,1]
        out = _squash(s, 1, approx_recip)                             # [CB,O,1]
        delta = jnp.sum(priors * out, axis=1, keepdims=True)          # [CB,1,R]
        logits = logits + delta

    # Final iteration: only the squashed output is needed.  Produce it
    # directly in lane-major [CB, O] form so the store is lane-dense.
    probs = _route_softmax(logits, approx_recip)                      # [CB,1,R]
    s2 = jnp.sum(probs * priors, axis=-1)                             # [CB, O]
    o_ref[...] = _squash(s2, -1, approx_recip)                        # [CB, O]


def prepare_route_weights(route_weights):
    """One-time parameter prep: [C, R, I, O] -> [I, C, O, R].

    Done once outside the per-call jitted forward so the weight transpose is
    not re-paid (extra HBM read+write) on every call, and so the resident
    VMEM weight slab is R-minor (lane-dense) instead of O-minor (8x padded).
    """
    return jnp.transpose(route_weights, (2, 0, 3, 1))


def capsule_layer(x, route_weights_t, num_iterations=NUM_ROUTING_ITERATIONS,
                  approx_recip=False):
    """x: [B, R, I], route_weights_t: [I, C, O, R] -> [C, B, 1, 1, O]."""
    B, R, I = x.shape
    I2, C, O, R2 = route_weights_t.shape
    assert (I2, R2) == (I, R)

    # x changes per call, so its (cheap) transpose to [I, B, R] lives inside
    # the jitted forward; it makes the in-kernel contraction loop pure
    # leading-index picks (no cross-lane extract per unrolled iteration).
    x_t = jnp.transpose(x, (2, 0, 1))

    kernel = functools.partial(capsule_routing_kernel,
                               num_iterations=num_iterations,
                               approx_recip=approx_recip)
    out2d = pl.pallas_call(
        kernel,
        out_shape=jax.ShapeDtypeStruct((C * B, O), jnp.float32),
        grid=(1,),
        in_specs=[
            pl.BlockSpec((I, B, R), lambda g: (0, 0, 0)),          # x   (whole)
            pl.BlockSpec((I, C, O, R), lambda g: (0, 0, 0, 0)),    # weights
        ],
        out_specs=pl.BlockSpec((C * B, O), lambda g: (0, 0)),
        compiler_params=pltpu.CompilerParams(
            dimension_semantics=("arbitrary",)),
    )(x_t, route_weights_t)
    return out2d.reshape(C, B, 1, 1, O)


# ----------------------------------------------------------------------------
# Pure-JAX reference mirroring the PyTorch forward.
# ----------------------------------------------------------------------------
def _squash_ref(t, axis=-1):
    sq = jnp.sum(t * t, axis=axis, keepdims=True)
    return (sq / (1.0 + sq)) * t / jnp.sqrt(sq)


def capsule_layer_ref(x, route_weights, num_iterations=NUM_ROUTING_ITERATIONS):
    priors = jnp.einsum("bri,crio->cbro", x, route_weights)[:, :, :, None, :]
    logits = jnp.zeros_like(priors)
    outputs = None
    for i in range(num_iterations):
        probs = jax.nn.softmax(logits, axis=2)
        outputs = _squash_ref(jnp.sum(probs * priors, axis=2, keepdims=True))
        if i != num_iterations - 1:
            delta = jnp.sum(priors * outputs, axis=-1, keepdims=True)
            logits = logits + delta
    return outputs


if __name__ == "__main__":
    # Small shapes consistent with the routing branch of CapsuleLayer.
    B, R, I, O, C = 2, 32, 8, 16, 4   # batch, route_nodes, in_ch, out_ch, capsules

    key = jax.random.PRNGKey(0)
    kx, kw = jax.random.split(key)
    x = jax.random.normal(kx, (B, R, I), dtype=jnp.float32)
    # nn.Parameter(torch.randn(C, R, I, O)) -> deterministic normal init
    route_weights = jax.random.normal(kw, (C, R, I, O), dtype=jnp.float32)

    # Parameter prep: done once, outside the jitted per-call forward.
    route_weights_t = prepare_route_weights(route_weights)

    fwd = jax.jit(capsule_layer,
                  static_argnames=("num_iterations", "approx_recip"))
    out = jax.block_until_ready(fwd(x, route_weights_t))

    ref = capsule_layer_ref(x, route_weights)
    assert out.shape == (C, B, 1, 1, O), out.shape
    assert jnp.allclose(out, ref, atol=3e-5, rtol=1e-4), "mismatch vs reference"

    print("KERNEL_OK")
</pallas_src>

<mosaic_0001>
module attributes {stable_mosaic.version = 11 : i64} {
  func.func @capsule_routing_kernel(%arg0: i32, %arg1: memref<8x2x32xf32, #tpu.memory_space<vmem>>, %arg2: memref<8x4x16x32xf32, #tpu.memory_space<vmem>>, %arg3: memref<8x16xf32, #tpu.memory_space<vmem>>) attributes {dimension_semantics = [#tpu.dimension_semantics<arbitrary>], iteration_bounds = array<i64: 1>, scalar_prefetch = 0 : i64, scratch_operands = 0 : i64, tpu.core_type = #tpu.core_type<tc>, window_params = [{pipeline_mode = #tpu.pipeline_mode<synchronous>, transform_indices = @transform_0, window_bounds = array<i64: 8, 2, 32>}, {pipeline_mode = #tpu.pipeline_mode<synchronous>, transform_indices = @transform_1, window_bounds = array<i64: 8, 4, 16, 32>}, {pipeline_mode = #tpu.pipeline_mode<synchronous>, transform_indices = @transform_2, window_bounds = array<i64: 8, 16>}]} {
    %c0 = arith.constant 0 : index
    %c0_0 = arith.constant 0 : index
    %c0_1 = arith.constant 0 : index
    %0 = vector.load %arg1[%c0, %c0_0, %c0_1] : memref<8x2x32xf32, #tpu.memory_space<vmem>>, vector<1x2x32xf32>
    %1 = vector.shape_cast %0 : vector<1x2x32xf32> to vector<2x32xf32>
    %2 = vector.shape_cast %1 : vector<2x32xf32> to vector<1x2x1x32xf32>
    %c0_2 = arith.constant 0 : index
    %c0_3 = arith.constant 0 : index
    %c0_4 = arith.constant 0 : index
    %c0_5 = arith.constant 0 : index
    %3 = vector.load %arg2[%c0_2, %c0_3, %c0_4, %c0_5] : memref<8x4x16x32xf32, #tpu.memory_space<vmem>>, vector<1x4x16x32xf32>
    %4 = vector.shape_cast %3 : vector<1x4x16x32xf32> to vector<4x16x32xf32>
    %5 = vector.shape_cast %4 : vector<4x16x32xf32> to vector<4x1x16x32xf32>
    %6 = vector.broadcast %2 : vector<1x2x1x32xf32> to vector<4x2x16x32xf32>
    %7 = vector.broadcast %5 : vector<4x1x16x32xf32> to vector<4x2x16x32xf32>
    %8 = arith.mulf %6, %7 : vector<4x2x16x32xf32>
    %c1 = arith.constant 1 : index
    %c0_6 = arith.constant 0 : index
    %c0_7 = arith.constant 0 : index
    %9 = vector.load %arg1[%c1, %c0_6, %c0_7] : memref<8x2x32xf32, #tpu.memory_space<vmem>>, vector<1x2x32xf32>
    %10 = vector.shape_cast %9 : vector<1x2x32xf32> to vector<2x32xf32>
    %11 = vector.shape_cast %10 : vector<2x32xf32> to vector<1x2x1x32xf32>
    %c1_8 = arith.constant 1 : index
    %c0_9 = arith.constant 0 : index
    %c0_10 = arith.constant 0 : index
    %c0_11 = arith.constant 0 : index
    %12 = vector.load %arg2[%c1_8, %c0_9, %c0_10, %c0_11] : memref<8x4x16x32xf32, #tpu.memory_space<vmem>>, vector<1x4x16x32xf32>
    %13 = vector.shape_cast %12 : vector<1x4x16x32xf32> to vector<4x16x32xf32>
    %14 = vector.shape_cast %13 : vector<4x16x32xf32> to vector<4x1x16x32xf32>
    %15 = vector.broadcast %11 : vector<1x2x1x32xf32> to vector<4x2x16x32xf32>
    %16 = vector.broadcast %14 : vector<4x1x16x32xf32> to vector<4x2x16x32xf32>
    %17 = arith.mulf %15, %16 : vector<4x2x16x32xf32>
    %18 = arith.addf %8, %17 : vector<4x2x16x32xf32>
    %c2 = arith.constant 2 : index
    %c0_12 = arith.constant 0 : index
    %c0_13 = arith.constant 0 : index
    %19 = vector.load %arg1[%c2, %c0_12, %c0_13] : memref<8x2x32xf32, #tpu.memory_space<vmem>>, vector<1x2x32xf32>
    %20 = vector.shape_cast %19 : vector<1x2x32xf32> to vector<2x32xf32>
    %21 = vector.shape_cast %20 : vector<2x32xf32> to vector<1x2x1x32xf32>
    %c2_14 = arith.constant 2 : index
    %c0_15 = arith.constant 0 : index
    %c0_16 = arith.constant 0 : index
    %c0_17 = arith.constant 0 : index
    %22 = vector.load %arg2[%c2_14, %c0_15, %c0_16, %c0_17] : memref<8x4x16x32xf32, #tpu.memory_space<vmem>>, vector<1x4x16x32xf32>
    %23 = vector.shape_cast %22 : vector<1x4x16x32xf32> to vector<4x16x32xf32>
    %24 = vector.shape_cast %23 : vector<4x16x32xf32> to vector<4x1x16x32xf32>
    %25 = vector.broadcast %21 : vector<1x2x1x32xf32> to vector<4x2x16x32xf32>
    %26 = vector.broadcast %24 : vector<4x1x16x32xf32> to vector<4x2x16x32xf32>
    %27 = arith.mulf %25, %26 : vector<4x2x16x32xf32>
    %28 = arith.addf %18, %27 : vector<4x2x16x32xf32>
    %c3 = arith.constant 3 : index
    %c0_18 = arith.constant 0 : index
    %c0_19 = arith.constant 0 : index
    %29 = vector.load %arg1[%c3, %c0_18, %c0_19] : memref<8x2x32xf32, #tpu.memory_space<vmem>>, vector<1x2x32xf32>
    %30 = vector.shape_cast %29 : vector<1x2x32xf32> to vector<2x32xf32>
    %31 = vector.shape_cast %30 : vector<2x32xf32> to vector<1x2x1x32xf32>
    %c3_20 = arith.constant 3 : index
    %c0_21 = arith.constant 0 : index
    %c0_22 = arith.constant 0 : index
    %c0_23 = arith.constant 0 : index
    %32 = vector.load %arg2[%c3_20, %c0_21, %c0_22, %c0_23] : memref<8x4x16x32xf32, #tpu.memory_space<vmem>>, vector<1x4x16x32xf32>
    %33 = vector.shape_cast %32 : vector<1x4x16x32xf32> to vector<4x16x32xf32>
    %34 = vector.shape_cast %33 : vector<4x16x32xf32> to vector<4x1x16x32xf32>
    %35 = vector.broadcast %31 : vector<1x2x1x32xf32> to vector<4x2x16x32xf32>
    %36 = vector.broadcast %34 : vector<4x1x16x32xf32> to vector<4x2x16x32xf32>
    %37 = arith.mulf %35, %36 : vector<4x2x16x32xf32>
    %38 = arith.addf %28, %37 : vector<4x2x16x32xf32>
    %c4 = arith.constant 4 : index
    %c0_24 = arith.constant 0 : index
    %c0_25 = arith.constant 0 : index
    %39 = vector.load %arg1[%c4, %c0_24, %c0_25] : memref<8x2x32xf32, #tpu.memory_space<vmem>>, vector<1x2x32xf32>
    %40 = vector.shape_cast %39 : vector<1x2x32xf32> to vector<2x32xf32>
    %41 = vector.shape_cast %40 : vector<2x32xf32> to vector<1x2x1x32xf32>
    %c4_26 = arith.constant 4 : index
    %c0_27 = arith.constant 0 : index
    %c0_28 = arith.constant 0 : index
    %c0_29 = arith.constant 0 : index
    %42 = vector.load %arg2[%c4_26, %c0_27, %c0_28, %c0_29] : memref<8x4x16x32xf32, #tpu.memory_space<vmem>>, vector<1x4x16x32xf32>
    %43 = vector.shape_cast %42 : vector<1x4x16x32xf32> to vector<4x16x32xf32>
    %44 = vector.shape_cast %43 : vector<4x16x32xf32> to vector<4x1x16x32xf32>
    %45 = vector.broadcast %41 : vector<1x2x1x32xf32> to vector<4x2x16x32xf32>
    %46 = vector.broadcast %44 : vector<4x1x16x32xf32> to vector<4x2x16x32xf32>
    %47 = arith.mulf %45, %46 : vector<4x2x16x32xf32>
    %48 = arith.addf %38, %47 : vector<4x2x16x32xf32>
    %c5 = arith.constant 5 : index
    %c0_30 = arith.constant 0 : index
    %c0_31 = arith.constant 0 : index
    %49 = vector.load %arg1[%c5, %c0_30, %c0_31] : memref<8x2x32xf32, #tpu.memory_space<vmem>>, vector<1x2x32xf32>
    %50 = vector.shape_cast %49 : vector<1x2x32xf32> to vector<2x32xf32>
    %51 = vector.shape_cast %50 : vector<2x32xf32> to vector<1x2x1x32xf32>
    %c5_32 = arith.constant 5 : index
    %c0_33 = arith.constant 0 : index
    %c0_34 = arith.constant 0 : index
    %c0_35 = arith.constant 0 : index
    %52 = vector.load %arg2[%c5_32, %c0_33, %c0_34, %c0_35] : memref<8x4x16x32xf32, #tpu.memory_space<vmem>>, vector<1x4x16x32xf32>
    %53 = vector.shape_cast %52 : vector<1x4x16x32xf32> to vector<4x16x32xf32>
    %54 = vector.shape_cast %53 : vector<4x16x32xf32> to vector<4x1x16x32xf32>
    %55 = vector.broadcast %51 : vector<1x2x1x32xf32> to vector<4x2x16x32xf32>
    %56 = vector.broadcast %54 : vector<4x1x16x32xf32> to vector<4x2x16x32xf32>
    %57 = arith.mulf %55, %56 : vector<4x2x16x32xf32>
    %58 = arith.addf %48, %57 : vector<4x2x16x32xf32>
    %c6 = arith.constant 6 : index
    %c0_36 = arith.constant 0 : index
    %c0_37 = arith.constant 0 : index
    %59 = vector.load %arg1[%c6, %c0_36, %c0_37] : memref<8x2x32xf32, #tpu.memory_space<vmem>>, vector<1x2x32xf32>
    %60 = vector.shape_cast %59 : vector<1x2x32xf32> to vector<2x32xf32>
    %61 = vector.shape_cast %60 : vector<2x32xf32> to vector<1x2x1x32xf32>
    %c6_38 = arith.constant 6 : index
    %c0_39 = arith.constant 0 : index
    %c0_40 = arith.constant 0 : index
    %c0_41 = arith.constant 0 : index
    %62 = vector.load %arg2[%c6_38, %c0_39, %c0_40, %c0_41] : memref<8x4x16x32xf32, #tpu.memory_space<vmem>>, vector<1x4x16x32xf32>
    %63 = vector.shape_cast %62 : vector<1x4x16x32xf32> to vector<4x16x32xf32>
    %64 = vector.shape_cast %63 : vector<4x16x32xf32> to vector<4x1x16x32xf32>
    %65 = vector.broadcast %61 : vector<1x2x1x32xf32> to vector<4x2x16x32xf32>
    %66 = vector.broadcast %64 : vector<4x1x16x32xf32> to vector<4x2x16x32xf32>
    %67 = arith.mulf %65, %66 : vector<4x2x16x32xf32>
    %68 = arith.addf %58, %67 : vector<4x2x16x32xf32>
    %c7 = arith.constant 7 : index
    %c0_42 = arith.constant 0 : index
    %c0_43 = arith.constant 0 : index
    %69 = vector.load %arg1[%c7, %c0_42, %c0_43] : memref<8x2x32xf32, #tpu.memory_space<vmem>>, vector<1x2x32xf32>
    %70 = vector.shape_cast %69 : vector<1x2x32xf32> to vector<2x32xf32>
    %71 = vector.shape_cast %70 : vector<2x32xf32> to vector<1x2x1x32xf32>
    %c7_44 = arith.constant 7 : index
    %c0_45 = arith.constant 0 : index
    %c0_46 = arith.constant 0 : index
    %c0_47 = arith.constant 0 : index
    %72 = vector.load %arg2[%c7_44, %c0_45, %c0_46, %c0_47] : memref<8x4x16x32xf32, #tpu.memory_space<vmem>>, vector<1x4x16x32xf32>
    %73 = vector.shape_cast %72 : vector<1x4x16x32xf32> to vector<4x16x32xf32>
    %74 = vector.shape_cast %73 : vector<4x16x32xf32> to vector<4x1x16x32xf32>
    %75 = vector.broadcast %71 : vector<1x2x1x32xf32> to vector<4x2x16x32xf32>
    %76 = vector.broadcast %74 : vector<4x1x16x32xf32> to vector<4x2x16x32xf32>
    %77 = arith.mulf %75, %76 : vector<4x2x16x32xf32>
    %78 = arith.addf %68, %77 : vector<4x2x16x32xf32>
    %79 = vector.shape_cast %78 : vector<4x2x16x32xf32> to vector<8x16x32xf32>
    %cst = arith.constant 0.000000e+00 : f32
    %80 = vector.broadcast %cst : f32 to vector<8x1x32xf32>
    %cst_48 = arith.constant dense<0xFF800000> : vector<8x1xf32>
    %81 = vector.multi_reduction <maximumf>, %80, %cst_48 [2] : vector<8x1x32xf32> to vector<8x1xf32>
    %82 = vector.shape_cast %81 : vector<8x1xf32> to vector<8x1x1xf32>
    %83 = vector.broadcast %82 : vector<8x1x1xf32> to vector<8x1x32xf32>
    %84 = arith.subf %80, %83 : vector<8x1x32xf32>
    %85 = math.exp %84 : vector<8x1x32xf32>
    %cst_49 = arith.constant dense<0.000000e+00> : vector<8x1xf32>
    %86 = vector.multi_reduction <add>, %85, %cst_49 [2] : vector<8x1x32xf32> to vector<8x1xf32>
    %87 = vector.shape_cast %86 : vector<8x1xf32> to vector<8x1x1xf32>
    %88 = tpu.reciprocal %87 : vector<8x1x1xf32> -> vector<8x1x1xf32>
    %89 = vector.broadcast %88 : vector<8x1x1xf32> to vector<8x1x32xf32>
    %90 = arith.mulf %85, %89 : vector<8x1x32xf32>
    %91 = vector.broadcast %90 : vector<8x1x32xf32> to vector<8x16x32xf32>
    %92 = arith.mulf %91, %79 : vector<8x16x32xf32>
    %cst_50 = arith.constant dense<0.000000e+00> : vector<8x16xf32>
    %93 = vector.multi_reduction <add>, %92, %cst_50 [2] : vector<8x16x32xf32> to vector<8x16xf32>
    %94 = vector.shape_cast %93 : vector<8x16xf32> to vector<8x16x1xf32>
    %95 = arith.mulf %94, %94 : vector<8x16x1xf32>
    %cst_51 = arith.constant dense<0.000000e+00> : vector<8x1xf32>
    %96 = vector.multi_reduction <add>, %95, %cst_51 [1] : vector<8x16x1xf32> to vector<8x1xf32>
    %97 = vector.shape_cast %96 : vector<8x1xf32> to vector<8x1x1xf32>
    %98 = math.rsqrt %97 : vector<8x1x1xf32>
    %99 = arith.mulf %97, %98 : vector<8x1x1xf32>
    %100 = vector.broadcast %99 : vector<8x1x1xf32> to vector<8x16x1xf32>
    %101 = arith.mulf %94, %100 : vector<8x16x1xf32>
    %cst_52 = arith.constant 1.000000e+00 : f32
    %102 = vector.broadcast %cst_52 : f32 to vector<8x1x1xf32>
    %103 = arith.addf %102, %97 : vector<8x1x1xf32>
    %104 = tpu.reciprocal %103 : vector<8x1x1xf32> -> vector<8x1x1xf32>
    %105 = vector.broadcast %104 : vector<8x1x1xf32> to vector<8x16x1xf32>
    %106 = arith.mulf %101, %105 : vector<8x16x1xf32>
    %107 = vector.broadcast %106 : vector<8x16x1xf32> to vector<8x16x32xf32>
    %108 = arith.mulf %79, %107 : vector<8x16x32xf32>
    %cst_53 = arith.constant dense<0.000000e+00> : vector<8x32xf32>
    %109 = vector.multi_reduction <add>, %108, %cst_53 [1] : vector<8x16x32xf32> to vector<8x32xf32>
    %110 = vector.shape_cast %109 : vector<8x32xf32> to vector<8x1x32xf32>
    %111 = arith.addf %80, %110 : vector<8x1x32xf32>
    %cst_54 = arith.constant dense<0xFF800000> : vector<8x1xf32>
    %112 = vector.multi_reduction <maximumf>, %111, %cst_54 [2] : vector<8x1x32xf32> to vector<8x1xf32>
    %113 = vector.shape_cast %112 : vector<8x1xf32> to vector<8x1x1xf32>
    %114 = vector.broadcast %113 : vector<8x1x1xf32> to vector<8x1x32xf32>
    %115 = arith.subf %111, %114 : vector<8x1x32xf32>
    %116 = math.exp %115 : vector<8x1x32xf32>
    %cst_55 = arith.constant dense<0.000000e+00> : vector<8x1xf32>
    %117 = vector.multi_reduction <add>, %116, %cst_55 [2] : vector<8x1x32xf32> to vector<8x1xf32>
    %118 = vector.shape_cast %117 : vector<8x1xf32> to vector<8x1x1xf32>
    %119 = tpu.reciprocal %118 : vector<8x1x1xf32> -> vector<8x1x1xf32>
    %120 = vector.broadcast %119 : vector<8x1x1xf32> to vector<8x1x32xf32>
    %121 = arith.mulf %116, %120 : vector<8x1x32xf32>
    %122 = vector.broadcast %121 : vector<8x1x32xf32> to vector<8x16x32xf32>
    %123 = arith.mulf %122, %79 : vector<8x16x32xf32>
    %cst_56 = arith.constant dense<0.000000e+00> : vector<8x16xf32>
    %124 = vector.multi_reduction <add>, %123, %cst_56 [2] : vector<8x16x32xf32> to vector<8x16xf32>
    %125 = vector.shape_cast %124 : vector<8x16xf32> to vector<8x16x1xf32>
    %126 = arith.mulf %125, %125 : vector<8x16x1xf32>
    %cst_57 = arith.constant dense<0.000000e+00> : vector<8x1xf32>
    %127 = vector.multi_reduction <add>, %126, %cst_57 [1] : vector<8x16x1xf32> to vector<8x1xf32>
    %128 = vector.shape_cast %127 : vector<8x1xf32> to vector<8x1x1xf32>
    %129 = math.rsqrt %128 : vector<8x1x1xf32>
    %130 = arith.mulf %128, %129 : vector<8x1x1xf32>
    %131 = vector.broadcast %130 : vector<8x1x1xf32> to vector<8x16x1xf32>
    %132 = arith.mulf %125, %131 : vector<8x16x1xf32>
    %cst_58 = arith.constant 1.000000e+00 : f32
    %133 = vector.broadcast %cst_58 : f32 to vector<8x1x1xf32>
    %134 = arith.addf %133, %128 : vector<8x1x1xf32>
    %135 = tpu.reciprocal %134 : vector<8x1x1xf32> -> vector<8x1x1xf32>
    %136 = vector.broadcast %135 : vector<8x1x1xf32> to vector<8x16x1xf32>
    %137 = arith.mulf %132, %136 : vector<8x16x1xf32>
    %138 = vector.broadcast %137 : vector<8x16x1xf32> to vector<8x16x32xf32>
    %139 = arith.mulf %79, %138 : vector<8x16x32xf32>
    %cst_59 = arith.constant dense<0.000000e+00> : vector<8x32xf32>
    %140 = vector.multi_reduction <add>, %139, %cst_59 [1] : vector<8x16x32xf32> to vector<8x32xf32>
    %141 = vector.shape_cast %140 : vector<8x32xf32> to vector<8x1x32xf32>
    %142 = arith.addf %111, %141 : vector<8x1x32xf32>
    %cst_60 = arith.constant dense<0xFF800000> : vector<8x1xf32>
    %143 = vector.multi_reduction <maximumf>, %142, %cst_60 [2] : vector<8x1x32xf32> to vector<8x1xf32>
    %144 = vector.shape_cast %143 : vector<8x1xf32> to vector<8x1x1xf32>
    %145 = vector.broadcast %144 : vector<8x1x1xf32> to vector<8x1x32xf32>
    %146 = arith.subf %142, %145 : vector<8x1x32xf32>
    %147 = math.exp %146 : vector<8x1x32xf32>
    %cst_61 = arith.constant dense<0.000000e+00> : vector<8x1xf32>
    %148 = vector.multi_reduction <add>, %147, %cst_61 [2] : vector<8x1x32xf32> to vector<8x1xf32>
    %149 = vector.shape_cast %148 : vector<8x1xf32> to vector<8x1x1xf32>
    %150 = tpu.reciprocal %149 : vector<8x1x1xf32> -> vector<8x1x1xf32>
    %151 = vector.broadcast %150 : vector<8x1x1xf32> to vector<8x1x32xf32>
    %152 = arith.mulf %147, %151 : vector<8x1x32xf32>
    %153 = vector.broadcast %152 : vector<8x1x32xf32> to vector<8x16x32xf32>
    %154 = arith.mulf %153, %79 : vector<8x16x32xf32>
    %cst_62 = arith.constant dense<0.000000e+00> : vector<8x16xf32>
    %155 = vector.multi_reduction <add>, %154, %cst_62 [2] : vector<8x16x32xf32> to vector<8x16xf32>
    %156 = arith.mulf %155, %155 : vector<8x16xf32>
    %cst_63 = arith.constant dense<0.000000e+00> : vector<8xf32>
    %157 = vector.multi_reduction <add>, %156, %cst_63 [1] : vector<8x16xf32> to vector<8xf32>
    %158 = vector.shape_cast %157 : vector<8xf32> to vector<8x1xf32>
    %159 = math.rsqrt %158 : vector<8x1xf32>
    %160 = arith.mulf %158, %159 : vector<8x1xf32>
    %161 = vector.broadcast %160 : vector<8x1xf32> to vector<8x16xf32>
    %162 = arith.mulf %155, %161 : vector<8x16xf32>
    %cst_64 = arith.constant 1.000000e+00 : f32
    %163 = vector.broadcast %cst_64 : f32 to vector<8x1xf32>
    %164 = arith.addf %163, %158 : vector<8x1xf32>
    %165 = tpu.reciprocal %164 : vector<8x1xf32> -> vector<8x1xf32>
    %166 = vector.broadcast %165 : vector<8x1xf32> to vector<8x16xf32>
    %167 = arith.mulf %162, %166 : vector<8x16xf32>
    %c0_65 = arith.constant 0 : index
    %c0_66 = arith.constant 0 : index
    %168 = vector.load %arg3[%c0_65, %c0_66] : memref<8x16xf32, #tpu.memory_space<vmem>>, vector<8x16xf32>
    tpu.vector_store %arg3[%c0_65, %c0_66], %167 {strides = array<i32>} : memref<8x16xf32, #tpu.memory_space<vmem>>, vector<8x16xf32>,
    return
  }
  func.func @transform_0(%arg0: i32) -> (i32, i32, i32) {
    %c0_i32 = arith.constant 0 : i32
    %c0_i32_0 = arith.constant 0 : i32
    %c0_i32_1 = arith.constant 0 : i32
    %c0_i32_2 = arith.constant 0 : i32
    return %c0_i32, %c0_i32_0, %c0_i32_1 : i32, i32, i32
  }
  func.func @transform_1(%arg0: i32) -> (i32, i32, i32, i32) {
    %c0_i32 = arith.constant 0 : i32
    %c0_i32_0 = arith.constant 0 : i32
    %c0_i32_1 = arith.constant 0 : i32
    %c0_i32_2 = arith.constant 0 : i32
    %c0_i32_3 = arith.constant 0 : i32
    return %c0_i32, %c0_i32_0, %c0_i32_1, %c0_i32_2 : i32, i32, i32, i32
  }
  func.func @transform_2(%arg0: i32) -> (i32, i32) {
    %c0_i32 = arith.constant 0 : i32
    %c0_i32_0 = arith.constant 0 : i32
    %c0_i32_1 = arith.constant 0 : i32
    return %c0_i32, %c0_i32_0 : i32, i32
  }
}

</mosaic_0001>

<bundles_post_ra>
// kernel: capsule_layer.1
= control target key start
LH: loop header
LB: loop body
LE: loop exit
PB: predicated region body
PF: predicated region fallthrough
CT: control target
= control target key end

     0   :  { %7 = vsyncpa [#allocation3], 0  ;;  %s3120_s0 = inlined_call_operand.vmem [shape: f32[8,2,32], index: 0, kind: input, shape index: {}]   ;;  %s3121_s1 = inlined_call_operand.hbm [shape: f32[8,4,16,32], index: 1, kind: input, shape index: {}]   ;;  %s3122_s2 = inlined_call_operand.hbm [shape: f32[8,16], index: 2, kind: output, shape index: {}]  }
   0x1   :  { %8 = vsyncpa [#allocation4], 0  ;;  %s2060_s9 = smov [#allocation2]  }
   0x2   :  { %s16_s10 = sshll.u32 %s2060_s9, 4  ;;  %s17_s10 = int_to_ptr.vmem [resolvable:$true] %s16_s10 }
   0x3   :  { %s2024_s11 = scalar_lea.vmem %s17_s10, 8192  ;;  %p2029_p1 = scmp.lt.s32.totalorder %s17_s10, %s17_s10 }
   0x4   :  { %p2025_p0 = scmp.ne.s32.totalorder %s17_s10, %s2024_s11  ;;  %p2030_p2 = scmp.lt.s32.totalorder %s2024_s11, %s2024_s11 }
   0x6   :  { %p2031_p3 = por %p2030_p2, %p2029_p1 }
   0x8   :  { %p2032_p4 = pnand %p2031_p3, %p2025_p0 }
   0xa   :  { %2035 = shalt.err (!%p2032_p4)
}
   0xb   :  { %s2061_s12 = smov 128   ;;  %s2062_s13 = smov 8   ;;  %vm616_vm0 = vcmask 261120  }
   0xc   :  { %22 = dma.hbm_to_vmem [thread:$0]  %s3121_s1, 8192, %s17_s10, [#allocation3], %s2061_s12, %s2061_s12, %s2062_s13  }
   0xd   :  { %2056 = dma.done.wait [#allocation3], 8192  }
   0xe   :  { %2057 = vsyncadd [#allocation3], 4294959104  ;;  %v2063_v0 = vmov 0.0   ;;  %v2064_v2 = vmov 1966171168   ;;  %v3123_v4 = vlaneseq  ;;  %v51_v17 = vld [vmem:[#allocation2 + $0x8] sm:$0xff] }
   0xf   :  { %v617_v1 = vsel %vm616_vm0, 1.0, %v2063_v0  ;;  %v37_v3 = vunpack.c.l.s4 %v2064_v2  ;;  %v1858_v8 = vld.sshfl [vmem:[%s3120_s0] sm:$0x11 pattern:$0x75316420]  ;;  %v111_v18 = vld [vmem:[#allocation2 + $0x48] sm:$0xff] }
  0x10   :  { %618 = vadd.xlane.f32.xlu0 %v617_v1  ;;  %v2087_v6 = vshrl.u32 %v3123_v4, 7  ;;  %v1860_v9 = vld.sshfl [vmem:[%s3120_s0 + $0x2] sm:$0x11 pattern:$0x75316420]  ;;  %v2122_v25 = vld [vmem:[#allocation2 + $0x88] sm:$0xff]  ;;  %v35_v26 = vcombine.high %v1858_v8, %v1858_v8 }
  0x11   :  { %v38_v5 = vunpack.c.0.s8 %v37_v3  ;;  %v1862_v13 = vld.sshfl [vmem:[%s3120_s0 + $0x4] sm:$0x11 pattern:$0x75316420]  ;;  %v94_v24 = vcombine.high %v1860_v9, %v1860_v9  ;;  %v2136_v34 = vld [vmem:[#allocation2 + $0xc8] sm:$0xff]  ;;  %v53_v2 = vld [vmem:[#allocation2 + $0x18] sm:$0xff] }
  0x12   :  { %3137 = vst [vmem:[#allocation8_spill] sm:$0xff] %v2087_v6  ;;  %v2100_v11 = vsub.s32 0, %v2087_v6  ;;  %v1864_v19 = vld.sshfl [vmem:[%s3120_s0 + $0x6] sm:$0x11 pattern:$0x75316420]  ;;  %v170_v33 = vcombine.high %v1862_v13, %v1862_v13 }
  0x13   :  { %v2090_v7 = vsub.s32 %v38_v5, %v2087_v6  ;;  %v2127_v27 = vld.sshfl [vmem:[%s3120_s0 + $0x8] sm:$0x11 pattern:$0x75316420]  ;;  %v50_v32 = vld [vmem:[#allocation2] sm:$0xff]  ;;  %v246_v47 = vcombine.high %v1864_v19, %v1864_v19  ;;  %v113_v3 = vld [vmem:[#allocation2 + $0x58] sm:$0xff] }
  0x14   :  { %3138 = vst [vmem:[#allocation9_spill] sm:$0xff] %v2100_v11  ;;  %v2141_v35 = vld.sshfl [vmem:[%s3120_s0 + $0xa] sm:$0x11 pattern:$0x75316420]  ;;  %v110_v36 = vld [vmem:[#allocation2 + $0x40] sm:$0xff]  ;;  %v322_v53 = vcombine.high %v2127_v27, %v2127_v27 }
  0x15   :  { %v42_v10 = vrot.slane %v1858_v8, %v2090_v7  ;;  %v101_v12 = vrot.slane %v1860_v9, %v2090_v7  ;;  %v177_v16 = vrot.slane %v1862_v13, %v2090_v7  ;;  %v253_v23 = vrot.slane %v1864_v19, %v2090_v7  ;;  %v2150_v40 = vld.sshfl [vmem:[%s3120_s0 + $0xc] sm:$0x11 pattern:$0x75316420]  ;;  %v186_v49 = vld [vmem:[#allocation2 + $0x80] sm:$0xff]  ;;  %v264_v19 = vld [vmem:[#allocation2 + $0xd0] sm:$0xff] }
  0x16   :  { %v329_v28 = vrot.slane %v2127_v27, %v2090_v7  ;;  %v49_v37 = vrot.slane %v35_v26, %v2090_v7  ;;  %v108_v38 = vrot.slane %v94_v24, %v2090_v7  ;;  %v405_v39 = vrot.slane %v2141_v35, %v2090_v7  ;;  %v2161_v48 = vld [vmem:[#allocation2 + $0x108] sm:$0xff]  ;;  %v262_v5 = vld [vmem:[#allocation2 + $0xc0] sm:$0xff]  ;;  %v52_v26 = vld [vmem:[#allocation2 + $0x10] sm:$0xff] }
  0x17   :  { %v2107_v14 = vrot.slane %v42_v10, %v2100_v11  ;;  %v2110_v15 = vrot.slane %v101_v12, %v2100_v11  ;;  %v2119_v22 = vrot.slane %v177_v16, %v2100_v11  ;;  %v2134_v31 = vrot.slane %v253_v23, %v2100_v11  ;;  %v2178_v55 = vld.sshfl [vmem:[%s3120_s0 + $0xe] sm:$0x11 pattern:$0x75316420]  ;;  %v2196_v8 = vld [vmem:[#allocation2 + $0x100] sm:$0xff]  ;;  %v112_v27 = vld [vmem:[#allocation2 + $0x50] sm:$0xff] }
  0x18   :  { %v2153_v41 = vrot.slane %v329_v28, %v2100_v11  ;;  %v481_v42 = vrot.slane %v2150_v40, %v2090_v7  ;;  %v2164_v50 = vrot.slane %v49_v37, %v2100_v11  ;;  %v2167_v51 = vrot.slane %v108_v38, %v2100_v11  ;;  %v2182_v57 = vld [vmem:[#allocation2 + $0x148] sm:$0xff]  ;;  %v2224_v37 = vld [vmem:[#allocation2 + $0x180] sm:$0xff]  ;;  %s2066_s0 = smov [#allocation5]  }
  0x19   :  { %v69_v20 = vmul.f32 %v2107_v14, %v51_v17  ;;  %v129_v21 = vmul.f32 %v2110_v15, %v111_v18  ;;  %v205_v30 = vmul.f32 %v2119_v22, %v2122_v25  ;;  %v281_v44 = vmul.f32 %v2134_v31, %v2136_v34  ;;  %v2193_v63 = vld [vmem:[#allocation2 + $0x188] sm:$0xff]  ;;  %v2226_v38 = vld [vmem:[#allocation2 + $0x1c0] sm:$0xff]  ;;  %s1849_s3 = sshll.u32 %s2066_s0, 4  ;;  %s1850_s3 = int_to_ptr.vmem [resolvable:$true] %s1849_s3 }
  0x1a   :  { %v68_v45 = vmul.f32 %v2107_v14, %v50_v32  ;;  %v128_v46 = vmul.f32 %v2110_v15, %v110_v36  ;;  %v184_v52 = vrot.slane %v170_v33, %v2090_v7  ;;  %v2173_v54 = vrot.slane %v405_v39, %v2100_v11  ;;  %s2036_s4 = scalar_lea.vmem %s1850_s3, 128  ;;  %p2041_p6 = scmp.lt.s32.totalorder %s1850_s3, %s1850_s3 }
  0x1b   :  { %v145_v29 = vadd.f32 %v129_v21, %v69_v20  ;;  %v398_v56 = vcombine.high %v2141_v35, %v2141_v35  ;;  %v474_v58 = vcombine.high %v2150_v40, %v2150_v40  ;;  %v2187_v59 = vrot.slane %v481_v42, %v2100_v11  ;;  %v2222_v35 = vld [vmem:[#allocation2 + $0x140] sm:$0xff]  ;;  %p2037_p5 = scmp.ne.s32.totalorder %s1850_s3, %s2036_s4  ;;  %p2042_p7 = scmp.lt.s32.totalorder %s2036_s4, %s2036_s4 }
  0x1c   :  { %3139 = vst [vmem:[#allocation10_spill] sm:$0xff] %v2173_v54  ;;  %v557_v60 = vrot.slane %v2178_v55, %v2090_v7  ;;  %v357_v62 = vmul.f32 %v2153_v41, %v2161_v48  ;;  %v144_v0 = vadd.f32 %v128_v46, %v68_v45  ;;  %v204_v1 = vmul.f32 %v2119_v22, %v186_v49 }
  0x1d   :  { %v221_v43 = vadd.f32 %v205_v30, %v145_v29  ;;  %v71_v9 = vmul.f32 %v2164_v50, %v51_v17  ;;  %v131_v10 = vmul.f32 %v2167_v51, %v111_v18  ;;  %v2201_v12 = vrot.slane %v184_v52, %v2100_v11  ;;  %v2217_v29 = vld [vmem:[#allocation2 + $0x1c8] sm:$0xff]  ;;  %p2043_p8 = por %p2042_p7, %p2041_p6 }
  0x1e   :  { %v260_v13 = vrot.slane %v246_v47, %v2090_v7  ;;  %v433_v16 = vmul.f32 %v2173_v54, %v2182_v57  ;;  %v70_v20 = vmul.f32 %v2164_v50, %v50_v32  ;;  %v130_v21 = vmul.f32 %v2167_v51, %v110_v36  ;;  %v189_v36 = vld [vmem:[#allocation2 + $0x98] sm:$0xff] }
  0x1f   :  { %v297_v61 = vadd.f32 %v281_v44, %v221_v43  ;;  %v509_v17 = vmul.f32 %v2187_v59, %v2193_v63  ;;  %v2213_v18 = vrot.slane %v557_v60, %v2100_v11  ;;  %v73_v23 = vmul.f32 %v2107_v14, %v53_v2  ;;  %p2044_p9 = pnand %p2043_p8, %p2037_p5 }
  0x20   :  { %v133_v24 = vmul.f32 %v2110_v15, %v113_v3  ;;  %v220_v30 = vadd.f32 %v204_v1, %v144_v0  ;;  %v280_v32 = vmul.f32 %v2134_v31, %v262_v5  ;;  %v356_v33 = vmul.f32 %v2153_v41, %v2196_v8  ;;  %v188_v0 = vld [vmem:[#allocation2 + $0x90] sm:$0xff] }
  0x21   :  { %3140 = vst [vmem:[#allocation11_spill] sm:$0xff] %v2213_v18  ;;  %v373_v28 = vadd.f32 %v357_v62, %v297_v61  ;;  %v147_v39 = vadd.f32 %v131_v10, %v71_v9  ;;  %v207_v42 = vmul.f32 %v2201_v12, %v2122_v25  ;;  %v2231_v43 = vrot.slane %v260_v13, %v2100_v11  ;;  %v265_v10 = vld [vmem:[#allocation2 + $0xd8] sm:$0xff] }
  0x22   :  { %v336_v44 = vrot.slane %v322_v53, %v2090_v7  ;;  %v146_v45 = vadd.f32 %v130_v21, %v70_v20  ;;  %v206_v46 = vmul.f32 %v2201_v12, %v186_v49  ;;  %v72_v47 = vmul.f32 %v2107_v14, %v52_v26 }
  0x23   :  { %v132_v52 = vmul.f32 %v2110_v15, %v112_v27  ;;  %v585_v60 = vmul.f32 %v2213_v18, %v2217_v29  ;;  %v432_v61 = vmul.f32 %v2173_v54, %v2222_v35  ;;  %v149_v62 = vadd.f32 %v133_v24, %v73_v23 }
  0x24   :  { %v209_v25 = vmul.f32 %v2119_v22, %v189_v36  ;;  %v449_v1 = vadd.f32 %v433_v16, %v373_v28  ;;  %v296_v9 = vadd.f32 %v280_v32, %v220_v30  ;;  %v508_v53 = vmul.f32 %v2187_v59, %v2224_v37 }
  0x25   :  { %v2246_v49 = vmul.f32 %v2213_v18, %v2226_v38  ;;  %v223_v13 = vadd.f32 %v207_v42, %v147_v39  ;;  %v283_v20 = vmul.f32 %v2231_v43, %v2136_v34  ;;  %v2251_v21 = vrot.slane %v336_v44, %v2100_v11  ;;  %v341_v44 = vld [vmem:[#allocation2 + $0x118] sm:$0xff] }
  0x26   :  { %v412_v23 = vrot.slane %v398_v56, %v2090_v7  ;;  %v222_v24 = vadd.f32 %v206_v46, %v146_v45  ;;  %v282_v16 = vmul.f32 %v2231_v43, %v262_v5  ;;  %v148_v28 = vadd.f32 %v132_v52, %v72_v47 }
  0x27   :  { %v208_v30 = vmul.f32 %v2119_v22, %v188_v0  ;;  %v225_v32 = vadd.f32 %v209_v25, %v149_v62  ;;  %v285_v4 = vmul.f32 %v2134_v31, %v265_v10  ;;  %v75_v39 = vmul.f32 %v2164_v50, %v53_v2  ;;  %v340_v25 = vld [vmem:[#allocation2 + $0x110] sm:$0xff] }
  0x28   :  { %v135_v42 = vmul.f32 %v2167_v51, %v113_v3  ;;  %v525_v34 = vadd.f32 %v509_v17, %v449_v1  ;;  %v488_v56 = vrot.slane %v474_v58, %v2090_v7  ;;  %v74_v5 = vmul.f32 %v2164_v50, %v52_v26 }
  0x29   :  { %v134_v45 = vmul.f32 %v2167_v51, %v112_v27  ;;  %v372_v46 = vadd.f32 %v356_v33, %v296_v9  ;;  %v299_v47 = vadd.f32 %v283_v20, %v223_v13  ;;  %v359_v52 = vmul.f32 %v2251_v21, %v2161_v48  ;;  %v417_v13 = vld [vmem:[#allocation2 + $0x158] sm:$0xff] }
  0x2a   :  { %v2268_v2 = vrot.slane %v412_v23, %v2100_v11  ;;  %v298_v3 = vadd.f32 %v282_v16, %v222_v24  ;;  %v358_v17 = vmul.f32 %v2251_v21, %v2196_v8  ;;  %v224_v62 = vadd.f32 %v208_v30, %v148_v28  ;;  %v2289_v28 = vld [vmem:[#allocation2 + $0x68] sm:$0xff] }
  0x2b   :  { %v284_v40 = vmul.f32 %v2134_v31, %v264_v19  ;;  %v301_v58 = vadd.f32 %v285_v4, %v225_v32  ;;  %v361_v26 = vmul.f32 %v2153_v41, %v341_v44  ;;  %v151_v27 = vadd.f32 %v135_v42, %v75_v39 }
  0x2c   :  { %v211_v33 = vmul.f32 %v2201_v12, %v189_v36  ;;  %v2276_v1 = vrot.slane %v488_v56, %v2100_v11  ;;  %v3141_v48 = vcombine.high %v2178_v55, %v2178_v55  ;;  %v150_v8 = vadd.f32 %v134_v45, %v74_v5  ;;  %v2287_v36 = vld [vmem:[#allocation2 + $0x28] sm:$0xff] }
  0x2d   :  { %v210_v20 = vmul.f32 %v2201_v12, %v188_v0  ;;  %v2283_v23 = vadd.f32 %v585_v60, %v525_v34  ;;  %v448_v4 = vadd.f32 %v432_v61, %v372_v46  ;;  %v375_v24 = vadd.f32 %v359_v52, %v299_v47  ;;  %v416_v0 = vld [vmem:[#allocation2 + $0x150] sm:$0xff]  ;;  %v493_v34 = vld [vmem:[#allocation2 + $0x198] sm:$0xff] }
  0x2e   :  { %v564_v9 = vrot.slane %v3141_v48, %v2090_v7  ;;  %v435_v16 = vmul.f32 %v2268_v2, %v2182_v57  ;;  %v374_v30 = vadd.f32 %v358_v17, %v298_v3  ;;  %v434_v55 = vmul.f32 %v2268_v2, %v2222_v35  ;;  %v2306_v3 = vld [vmem:[#allocation2 + $0xa8] sm:$0xff]  ;;  %v569_v17 = vld [vmem:[#allocation2 + $0x1d8] sm:$0xff] }
  0x2f   :  { %v300_v7 = vadd.f32 %v284_v40, %v224_v62  ;;  %v360_v32 = vmul.f32 %v2153_v41, %v340_v25  ;;  %v377_v39 = vadd.f32 %v361_v26, %v301_v58  ;;  %v437_v60 = vmul.f32 %v2173_v54, %v417_v13  ;;  %v492_v26 = vld [vmem:[#allocation2 + $0x190] sm:$0xff] }
  0x30   :  { %v227_v61 = vadd.f32 %v211_v33, %v151_v27  ;;  %v287_v42 = vmul.f32 %v2231_v43, %v265_v10  ;;  %v226_v57 = vadd.f32 %v210_v20, %v150_v8  ;;  %v286_v56 = vmul.f32 %v2231_v43, %v264_v19  ;;  %v2316_v20 = vld [vmem:[#allocation2 + $0xe8] sm:$0xff] }
  0x31   :  { %v77_v5 = vmul.f32 %v2107_v14, %v2287_v36  ;;  %v137_v35 = vmul.f32 %v2110_v15, %v2289_v28  ;;  %v524_v45 = vadd.f32 %v508_v53, %v448_v4  ;;  %v451_v46 = vadd.f32 %v435_v16, %v375_v24 }
  0x32   :  { %v511_v47 = vmul.f32 %v2276_v1, %v2193_v63  ;;  %v2304_v52 = vrot.slane %v564_v9, %v2100_v11  ;;  %v450_v10 = vadd.f32 %v434_v55, %v374_v30  ;;  %v510_v19 = vmul.f32 %v2276_v1, %v2224_v37  ;;  %v54_v30 = vld [vmem:[#allocation2 + $0x20] sm:$0xff] }
  0x33   :  { %v376_v62 = vadd.f32 %v360_v32, %v300_v7  ;;  %v436_v40 = vmul.f32 %v2173_v54, %v416_v0  ;;  %v453_v58 = vadd.f32 %v437_v60, %v377_v39  ;;  %v513_v53 = vmul.f32 %v2187_v59, %v493_v34  ;;  %v568_v32 = vld [vmem:[#allocation2 + $0x1d0] sm:$0xff]  ;;  %v570_v11 = vld [vmem:[#allocation2 + $0x1e0] sm:$0xff] }
  0x34   :  { %v303_v27 = vadd.f32 %v287_v42, %v227_v61  ;;  %v363_v63 = vmul.f32 %v2251_v21, %v341_v44  ;;  %v302_v33 = vadd.f32 %v286_v56, %v226_v57  ;;  %v362_v48 = vmul.f32 %v2251_v21, %v340_v25  ;;  %v114_v44 = vld [vmem:[#allocation2 + $0x60] sm:$0xff]  ;;  %v2328_v56 = vld [vmem:[#allocation2 + $0x128] sm:$0xff] }
  0x35   :  { %v153_v9 = vadd.f32 %v137_v35, %v77_v5  ;;  %v213_v8 = vmul.f32 %v2119_v22, %v2306_v3  ;;  %v527_v37 = vadd.f32 %v511_v47, %v451_v46  ;;  %v587_v4 = vmul.f32 %v2304_v52, %v2217_v29 }
  0x36   :  { %v586_v24 = vmul.f32 %v2304_v52, %v2226_v38  ;;  %v589_v16 = vmul.f32 %v2213_v18, %v569_v17  ;;  %v526_v55 = vadd.f32 %v510_v19, %v450_v10  ;;  %v452_v7 = vadd.f32 %v436_v40, %v376_v62  ;;  %v190_v10 = vld [vmem:[#allocation2 + $0xa0] sm:$0xff] }
  0x37   :  { %v512_v25 = vmul.f32 %v2187_v59, %v492_v26  ;;  %v439_v39 = vmul.f32 %v2268_v2, %v417_v13  ;;  %v529_v60 = vadd.f32 %v513_v53, %v453_v58  ;;  %v379_v61 = vadd.f32 %v363_v63, %v303_v27  ;;  %v419_v63 = vld [vmem:[#allocation2 + $0x168] sm:$0xff] }
  0x38   :  { %v438_v42 = vmul.f32 %v2268_v2, %v416_v0  ;;  %v289_v29 = vmul.f32 %v2134_v31, %v2316_v20  ;;  %v378_v57 = vadd.f32 %v362_v48, %v302_v33  ;;  %v229_v38 = vadd.f32 %v213_v8, %v153_v9  ;;  %v2348_v33 = vld [vmem:[#allocation2 + $0x1a8] sm:$0xff] }
  0x39   :  { %v76_v5 = vmul.f32 %v2107_v14, %v54_v30  ;;  %v136_v35 = vmul.f32 %v2110_v15, %v114_v44  ;;  %v2333_v46 = vadd.f32 %v2246_v49, %v524_v45  ;;  %v2335_v47 = vadd.f32 %v587_v4, %v527_v37  ;;  %v266_v37 = vld [vmem:[#allocation2 + $0xe0] sm:$0xff] }
  0x3a   :  { %v588_v13 = vmul.f32 %v2213_v18, %v568_v32  ;;  %v515_v0 = vmul.f32 %v2276_v1, %v493_v34  ;;  %v2339_v19 = vadd.f32 %v586_v24, %v526_v55  ;;  %v528_v62 = vadd.f32 %v512_v25, %v452_v7  ;;  %v2350_v34 = vld [vmem:[#allocation2 + $0x1e8] sm:$0xff]  ;;  %v2355_v4 = vld [vmem:[#allocation2 + $0x160] sm:$0xff] }
  0x3b   :  { %v591_v40 = vmul.f32 %v2304_v52, %v569_v17  ;;  %v514_v58 = vmul.f32 %v2276_v1, %v492_v26  ;;  %v2343_v53 = vadd.f32 %v589_v16, %v529_v60  ;;  %v455_v27 = vadd.f32 %v439_v39, %v379_v61  ;;  %v2353_v26 = vld [vmem:[#allocation2 + $0x120] sm:$0xff]  ;;  %v57_v61 = vld [vmem:[#allocation2 + $0x38] sm:$0xff] }
  0x3c   :  { %3142 = vst [vmem:[#allocation12_spill] sm:$0xff] %v2339_v19  ;;  %v590_v49 = vmul.f32 %v2304_v52, %v568_v32  ;;  %v365_v45 = vmul.f32 %v2153_v41, %v2328_v56  ;;  %v454_v48 = vadd.f32 %v438_v42, %v378_v57  ;;  %v305_v9 = vadd.f32 %v289_v29, %v229_v38  ;;  %v117_v29 = vld [vmem:[#allocation2 + $0x78] sm:$0xff]  ;;  %v56_v57 = vld [vmem:[#allocation2 + $0x30] sm:$0xff] }
  0x3d   :  { %3143 = vst [vmem:[#allocation13_spill] sm:$0xff] %v2343_v53  ;;  %v152_v8 = vadd.f32 %v136_v35, %v76_v5  ;;  %v212_v17 = vmul.f32 %v2119_v22, %v190_v10  ;;  %v79_v24 = vmul.f32 %v2164_v50, %v2287_v36  ;;  %v139_v16 = vmul.f32 %v2167_v51, %v2289_v28  ;;  %v116_v38 = vld [vmem:[#allocation2 + $0x70] sm:$0xff] }
  0x3e   :  { %v78_v55 = vmul.f32 %v2164_v50, %v54_v30  ;;  %v138_v7 = vmul.f32 %v2167_v51, %v114_v44  ;;  %v2363_v25 = vadd.f32 %v588_v13, %v528_v62  ;;  %v441_v32 = vmul.f32 %v2173_v54, %v419_v63  ;;  %v494_v62 = vld [vmem:[#allocation2 + $0x1a0] sm:$0xff] }
  0x3f   :  { %v517_v39 = vmul.f32 %v2187_v59, %v2348_v33  ;;  %v2370_v60 = vmul.f32 %v2213_v18, %v2350_v34  ;;  %v531_v42 = vadd.f32 %v515_v0, %v455_v27  ;;  %v288_v28 = vmul.f32 %v2134_v31, %v266_v37 }
  0x40   :  { %3144 = vst [vmem:[#allocation14_spill] sm:$0xff] %v2363_v25  ;;  %v364_v30 = vmul.f32 %v2153_v41, %v2353_v26  ;;  %v440_v44 = vmul.f32 %v2173_v54, %v2355_v4  ;;  %v530_v5 = vadd.f32 %v514_v58, %v454_v48  ;;  %v381_v35 = vadd.f32 %v365_v45, %v305_v9  ;;  %v192_v9 = vld [vmem:[#allocation2 + $0xb0] sm:$0xff] }
  0x41   :  { %v228_v13 = vadd.f32 %v212_v17, %v152_v8  ;;  %v155_v6 = vadd.f32 %v139_v16, %v79_v24  ;;  %v215_v0 = vmul.f32 %v2201_v12, %v2306_v3  ;;  %v154_v27 = vadd.f32 %v138_v7, %v78_v55 }
  0x42   :  { %v214_v25 = vmul.f32 %v2201_v12, %v190_v10  ;;  %v81_v53 = vmul.f32 %v2107_v14, %v57_v61  ;;  %v141_v54 = vmul.f32 %v2110_v15, %v117_v29  ;;  %v80_v19 = vmul.f32 %v2107_v14, %v56_v57  ;;  %v193_v10 = vld [vmem:[#allocation2 + $0xb8] sm:$0xff] }
  0x43   :  { %v2384_v58 = vadd.f32 %v591_v40, %v531_v42  ;;  %v2387_v45 = vmul.f32 %v2187_v59, %v494_v62  ;;  %v2390_v48 = vmul.f32 %v2213_v18, %v570_v11  ;;  %v291_v3 = vmul.f32 %v2231_v43, %v2316_v20 }
  0x44   :  { %v457_v8 = vadd.f32 %v441_v32, %v381_v35  ;;  %v304_v17 = vadd.f32 %v288_v28, %v228_v13  ;;  %v367_v14 = vmul.f32 %v2251_v21, %v2328_v56  ;;  %v2397_v40 = vadd.f32 %v590_v49, %v530_v5  ;;  %v268_v32 = vld [vmem:[#allocation2 + $0xf0] sm:$0xff] }
  0x45   :  { %3145 = vst [vmem:[#allocation15_spill] sm:$0xff] %v2384_v58  ;;  %v231_v24 = vadd.f32 %v215_v0, %v155_v6  ;;  %v230_v16 = vadd.f32 %v214_v25, %v154_v27  ;;  %v290_v55 = vmul.f32 %v2231_v43, %v266_v37  ;;  %v157_v7 = vadd.f32 %v141_v54, %v81_v53  ;;  %v269_v58 = vld [vmem:[#allocation2 + $0xf8] sm:$0xff] }
  0x46   :  { %v217_v42 = vmul.f32 %v2119_v22, %v193_v10  ;;  %v216_v20 = vmul.f32 %v2119_v22, %v192_v9  ;;  %v83_v28 = vmul.f32 %v2164_v50, %v57_v61  ;;  %v143_v56 = vmul.f32 %v2167_v51, %v117_v29 }
  0x47   :  { %v142_v49 = vmul.f32 %v2167_v51, %v116_v38  ;;  %v533_v6 = vadd.f32 %v517_v39, %v457_v8  ;;  %v380_v25 = vadd.f32 %v364_v30, %v304_v17  ;;  %v519_v54 = vmul.f32 %v2276_v1, %v2348_v33  ;;  %v345_v39 = vld [vmem:[#allocation2 + $0x138] sm:$0xff]  ;;  %v344_v33 = vld [vmem:[#allocation2 + $0x130] sm:$0xff] }
  0x48   :  { %v307_v22 = vadd.f32 %v291_v3, %v231_v24  ;;  %v306_v53 = vadd.f32 %v290_v55, %v230_v16  ;;  %v366_v37 = vmul.f32 %v2251_v21, %v2353_v26  ;;  %v442_v61 = vmul.f32 %v2268_v2, %v2355_v4  ;;  %v3146_v16 = vld [vmem:[#allocation12_spill] sm:$0xff] }
  0x49   :  { %v293_v51 = vmul.f32 %v2134_v31, %v269_v58  ;;  %v292_v29 = vmul.f32 %v2134_v31, %v268_v32  ;;  %v218_v5 = vmul.f32 %v2201_v12, %v192_v9  ;;  %v2421_v35 = vadd.f32 %v2370_v60, %v533_v6  ;;  %v496_v6 = vld [vmem:[#allocation2 + $0x1b0] sm:$0xff] }
  0x4a   :  { %v456_v26 = vadd.f32 %v440_v44, %v380_v25  ;;  %v518_v4 = vmul.f32 %v2276_v1, %v494_v62  ;;  %v594_v13 = vmul.f32 %v2304_v52, %v570_v11  ;;  %v382_v27 = vadd.f32 %v366_v37, %v306_v53  ;;  %v421_v44 = vld [vmem:[#allocation2 + $0x178] sm:$0xff]  ;;  %v420_v11 = vld [vmem:[#allocation2 + $0x170] sm:$0xff] }
  0x4b   :  { %v369_v31 = vmul.f32 %v2153_v41, %v345_v39  ;;  %v295_v62 = vmul.f32 %v2231_v43, %v269_v58  ;;  %v294_v17 = vmul.f32 %v2231_v43, %v268_v32  ;;  %v497_v43 = vld [vmem:[#allocation2 + $0x1b8] sm:$0xff]  ;;  %v370_v53 = vmul.f32 %v2251_v21, %v344_v33 }
  0x4c   :  { %v532_v58 = vadd.f32 %v2387_v45, %v456_v26  ;;  %v572_v26 = vld [vmem:[#allocation2 + $0x1f0] sm:$0xff]  ;;  %vm1496_vm1 = vcmask 130112   ;;  %vm1561_vm2 = vcmask 1041409   ;;  %vm1563_vm3 = vcmask 1042434  }
  0x4d   :  { %vm1565_vm4 = vcmask 1043459   ;;  %vm1567_vm5 = vcmask 1044484   ;;  %vm1569_vm6 = vcmask 1045509   ;;  %vm1571_vm7 = vcmask 1046534  }
  0x4e   :  { %vm1573_vm8 = vcmask 1047559   ;;  %vm1576_vm9 = vcmask 130048  }
  0x99   :  { %v619_v36 = vpop.xlane.xlu0 %618 }
  0x9a   :  { %1882 = vrcp.f32 %v619_v36  ;;  %v140_v36 = vmul.f32 %v2110_v15, %v116_v38  ;;  %v443_v15 = vmul.f32 %v2268_v2, %v419_v63  ;;  %v82_v63 = vmul.f32 %v2164_v50, %v56_v57 }
  0x9b   :  { %v233_v50 = vadd.f32 %v217_v42, %v157_v7  ;;  %v159_v57 = vadd.f32 %v143_v56, %v83_v28  ;;  %v3147_v42 = vld [vmem:[#allocation10_spill] sm:$0xff]  ;;  %v458_v28 = vadd.f32 %v442_v61, %v382_v27 }
  0x9c   :  { %v156_v18 = vadd.f32 %v140_v36, %v80_v19  ;;  %v2410_v19 = vmul.f32 %v2304_v52, %v2350_v34  ;;  %v219_v34 = vmul.f32 %v2201_v12, %v193_v10  ;;  %v158_v38 = vadd.f32 %v142_v49, %v82_v63  ;;  %v3149_v61 = vld [vmem:[#allocation14_spill] sm:$0xff] }
  0x9d   :  { %v368_v36 = vmul.f32 %v2153_v41, %v344_v33  ;;  %v309_v60 = vadd.f32 %v293_v51, %v233_v50  ;;  %v444_v32 = vmul.f32 %v3147_v42, %v420_v11  ;;  %v371_v63 = vmul.f32 %v2251_v21, %v345_v39  ;;  %v573_v33 = vld [vmem:[#allocation2 + $0x1f8] sm:$0xff] }
  0x9e   :  { %v232_v30 = vadd.f32 %v216_v20, %v156_v18  ;;  %v383_v18 = vadd.f32 %v367_v14, %v307_v22  ;;  %v235_v9 = vadd.f32 %v219_v34, %v159_v57  ;;  %v234_v8 = vadd.f32 %v218_v5, %v158_v38 }
  0x9f   :  { %v445_v20 = vmul.f32 %v3147_v42, %v421_v44  ;;  %v385_v56 = vadd.f32 %v369_v31, %v309_v60  ;;  %v2453_v39 = vadd.f32 %v2390_v48, %v532_v58  ;;  %v534_v57 = vadd.f32 %v518_v4, %v458_v28 }
  0xa0   :  { %v308_v10 = vadd.f32 %v292_v29, %v232_v30  ;;  %v459_v7 = vadd.f32 %v443_v15, %v383_v18  ;;  %v311_v25 = vadd.f32 %v295_v62, %v235_v9  ;;  %v310_v22 = vadd.f32 %v294_v17, %v234_v8  ;;  %v3148_v15 = vld [vmem:[#allocation13_spill] sm:$0xff] }
  0xa1   :  { %v521_v29 = vmul.f32 %v2187_v59, %v497_v43  ;;  %v461_v21 = vadd.f32 %v445_v20, %v385_v56  ;;  %v520_v34 = vmul.f32 %v2187_v59, %v496_v6  ;;  %v447_v38 = vmul.f32 %v2268_v2, %v421_v44 }
  0xa2   :  { %v384_v49 = vadd.f32 %v368_v36, %v308_v10  ;;  %v535_v30 = vadd.f32 %v519_v54, %v459_v7  ;;  %v387_v18 = vadd.f32 %v371_v63, %v311_v25  ;;  %v386_v27 = vadd.f32 %v370_v53, %v310_v22  ;;  %v3150_v54 = vld [vmem:[#allocation15_spill] sm:$0xff] }
  0xa3   :  { %v446_v31 = vmul.f32 %v2268_v2, %v420_v11  ;;  %v2469_v44 = vadd.f32 %v594_v13, %v534_v57  ;;  %v537_v2 = vadd.f32 %v521_v29, %v461_v21  ;;  %v523_v10 = vmul.f32 %v2276_v1, %v497_v43 }
  0xa4   :  { %v460_v5 = vadd.f32 %v444_v32, %v384_v49  ;;  %v2466_v59 = vadd.f32 %v2410_v19, %v535_v30  ;;  %v463_v9 = vadd.f32 %v447_v38, %v387_v18  ;;  %v522_v17 = vmul.f32 %v2276_v1, %v496_v6 }
  0xa5   :  { %v462_v8 = vadd.f32 %v446_v31, %v386_v27  ;;  %v598_v42 = vmul.f32 %v2304_v52, %v572_v26 }
  0xa6   :  { %v536_v11 = vadd.f32 %v520_v34, %v460_v5  ;;  %v539_v7 = vadd.f32 %v523_v10, %v463_v9 }
  0xa7   :  { %v2425_v0 = vpop.eup %1882  ;;  %v538_v1 = vadd.f32 %v522_v17, %v462_v8 }
  0xa8   :  { %v622_v3 = vmul.f32 %v2425_v0, %v2283_v23  ;;  %v621_v12 = vmul.f32 %v2425_v0, %v2333_v46  ;;  %v624_v24 = vmul.f32 %v2425_v0, %v2335_v47  ;;  %v623_v55 = vmul.f32 %v2425_v0, %v3146_v16 }
  0xa9   :  { %v626_v50 = vmul.f32 %v2425_v0, %v3148_v15  ;;  %v625_v51 = vmul.f32 %v2425_v0, %v3149_v61  ;;  %v627_v4 = vmul.f32 %v2425_v0, %v2397_v40  ;;  %v630_v19 = vmul.f32 %v2425_v0, %v2421_v35 }
  0xaa   :  { %v640_v14 = vsel %vm616_vm0, %v622_v3, 0.0  ;;  %v637_v41 = vsel %vm616_vm0, %v621_v12, 0.0  ;;  %v646_v37 = vsel %vm616_vm0, %v624_v24, 0.0  ;;  %v643_v45 = vsel %vm616_vm0, %v623_v55, 0.0  ;;  %v3151_v12 = vld [vmem:[#allocation11_spill] sm:$0xff] }
  0xab   :  { %641 = vadd.xlane.f32.xlu1 %v640_v14  ;;  %638 = vadd.xlane.f32.xlu0 %v637_v41  ;;  %v652_v36 = vsel %vm616_vm0, %v626_v50, 0.0  ;;  %v649_v48 = vsel %vm616_vm0, %v625_v51, 0.0  ;;  %v628_v3 = vmul.f32 %v2425_v0, %v3150_v54  ;;  %v597_v60 = vmul.f32 %v3151_v12, %v573_v33 }
  0xac   :  { %v596_v62 = vmul.f32 %v3151_v12, %v572_v26  ;;  %v655_v41 = vsel %vm616_vm0, %v627_v4, 0.0  ;;  %v629_v13 = vmul.f32 %v2425_v0, %v2453_v39  ;;  %v599_v55 = vmul.f32 %v2304_v52, %v573_v33 }
  0xad   :  { %v658_v14 = vsel %vm616_vm0, %v628_v3, 0.0  ;;  %v2480_v24 = vadd.f32 %v597_v60, %v537_v2  ;;  %v664_v20 = vsel %vm616_vm0, %v630_v19, 0.0  ;;  %v632_v56 = vmul.f32 %v2425_v0, %v2466_v59 }
  0xae   :  { %v2483_v58 = vadd.f32 %v596_v62, %v536_v11  ;;  %v661_v28 = vsel %vm616_vm0, %v629_v13, 0.0  ;;  %v631_v43 = vmul.f32 %v2425_v0, %v2469_v44  ;;  %v2492_v32 = vadd.f32 %v599_v55, %v539_v7 }
  0xaf   :  { %647 = vadd.xlane.f32.xlu0 %v646_v37  ;;  %644 = vadd.xlane.f32.xlu1 %v643_v45  ;;  %v2494_v63 = vadd.f32 %v598_v42, %v538_v1  ;;  %v670_v49 = vsel %vm616_vm0, %v632_v56, 0.0  ;;  %v634_v6 = vmul.f32 %v2425_v0, %v2480_v24 }
  0xb0   :  { %v667_v52 = vsel %vm616_vm0, %v631_v43, 0.0  ;;  %v633_v25 = vmul.f32 %v2425_v0, %v2483_v58  ;;  %v636_v37 = vmul.f32 %v2425_v0, %v2492_v32 }
  0xb1   :  { %v676_v22 = vsel %vm616_vm0, %v634_v6, 0.0  ;;  %v635_v45 = vmul.f32 %v2425_v0, %v2494_v63 }
  0xb2   :  { %v673_v53 = vsel %vm616_vm0, %v633_v25, 0.0  ;;  %v682_v50 = vsel %vm616_vm0, %v636_v37, 0.0 }
  0xb3   :  { %653 = vadd.xlane.f32.xlu0 %v652_v36  ;;  %650 = vadd.xlane.f32.xlu1 %v649_v48  ;;  %v679_v51 = vsel %vm616_vm0, %v635_v45, 0.0 }
  0xb7   :  { %659 = vadd.xlane.f32.xlu0 %v658_v14  ;;  %656 = vadd.xlane.f32.xlu1 %v655_v41 }
  0xbb   :  { %665 = vadd.xlane.f32.xlu0 %v664_v20  ;;  %662 = vadd.xlane.f32.xlu1 %v661_v28 }
  0xbf   :  { %671 = vadd.xlane.f32.xlu0 %v670_v49  ;;  %668 = vadd.xlane.f32.xlu1 %v667_v52 }
  0xc3   :  { %677 = vadd.xlane.f32.xlu0 %v676_v22  ;;  %674 = vadd.xlane.f32.xlu1 %v673_v53 }
  0xc7   :  { %683 = vadd.xlane.f32.xlu0 %v682_v50  ;;  %680 = vadd.xlane.f32.xlu1 %v679_v51 }
 0x134   :  { %v2510_v30 = vpop.xlane.xlu1 %641  ;;  %v2512_v29 = vpop.xlane.xlu0 %638 }
 0x135   :  { %v686_v57 = vmul.f32 %v2510_v30, %v2510_v30  ;;  %v685_v21 = vmul.f32 %v2512_v29, %v2512_v29 }
 0x137   :  { %v701_v33 = vadd.f32 %v686_v57, %v685_v21 }
 0x138   :  { %v2518_v0 = vpop.xlane.xlu0 %647  ;;  %v2520_v34 = vpop.xlane.xlu1 %644 }
 0x139   :  { %v702_v38 = vrot.slane %v701_v33, 4  ;;  %v688_v5 = vmul.f32 %v2518_v0, %v2518_v0  ;;  %v687_v26 = vmul.f32 %v2520_v34, %v2520_v34 }
 0x13b   :  { %v703_v18 = vadd.f32 %v702_v38, %v701_v33  ;;  %v708_v27 = vadd.f32 %v688_v5, %v687_v26 }
 0x13c   :  { %v2526_v31 = vpop.xlane.xlu0 %653  ;;  %v2528_v36 = vpop.xlane.xlu1 %650 }
 0x13d   :  { %v704_v48 = vrot.slane %v703_v18, 2  ;;  %v709_v3 = vrot.slane %v708_v27, 4  ;;  %v690_v4 = vmul.f32 %v2526_v31, %v2526_v31  ;;  %v689_v12 = vmul.f32 %v2528_v36, %v2528_v36 }
 0x13f   :  { %v705_v60 = vadd.f32 %v704_v48, %v703_v18  ;;  %v710_v2 = vadd.f32 %v709_v3, %v708_v27  ;;  %v715_v62 = vadd.f32 %v690_v4, %v689_v12 }
 0x140   :  { %v2534_v10 = vpop.xlane.xlu0 %659  ;;  %v2536_v11 = vpop.xlane.xlu1 %656 }
 0x141   :  { %v706_v9 = vrot.slane %v705_v60, 1  ;;  %v711_v8 = vrot.slane %v710_v2, 2  ;;  %v716_v17 = vrot.slane %v715_v62, 4  ;;  %v692_v14 = vmul.f32 %v2534_v10, %v2534_v10 }
 0x142   :  { %v691_v41 = vmul.f32 %v2536_v11, %v2536_v11 }
 0x143   :  { %v707_v19 = vadd.f32 %v706_v9, %v705_v60  ;;  %v712_v13 = vadd.f32 %v711_v8, %v710_v2  ;;  %v717_v55 = vadd.f32 %v716_v17, %v715_v62 }
 0x144   :  { %v722_v7 = vadd.f32 %v692_v14, %v691_v41  ;;  %v2542_v1 = vpop.xlane.xlu0 %665  ;;  %v2544_v42 = vpop.xlane.xlu1 %662 }
 0x145   :  { %1884 = vrsqrt.f32 %v707_v19  ;;  %v789_v20 = vadd.f32 1.0, %v707_v19  ;;  %v713_v28 = vrot.slane %v712_v13, 1  ;;  %v718_v56 = vrot.slane %v717_v55, 2 }
 0x146   :  { %v723_v43 = vrot.slane %v722_v7, 4  ;;  %v694_v49 = vmul.f32 %v2542_v1, %v2542_v1  ;;  %v693_v52 = vmul.f32 %v2544_v42, %v2544_v42 }
 0x147   :  { %v714_v6 = vadd.f32 %v713_v28, %v712_v13  ;;  %v719_v25 = vadd.f32 %v718_v56, %v717_v55  ;;  %1886 = vrcp.f32 %v789_v20 }
 0x148   :  { %v724_v22 = vadd.f32 %v723_v43, %v722_v7  ;;  %v729_v53 = vadd.f32 %v694_v49, %v693_v52  ;;  %v2550_v37 = vpop.xlane.xlu0 %671  ;;  %v2552_v45 = vpop.xlane.xlu1 %668 }
 0x149   :  { %1888 = vrsqrt.f32 %v714_v6  ;;  %v790_v50 = vadd.f32 1.0, %v714_v6  ;;  %v720_v51 = vrot.slane %v719_v25, 1  ;;  %v696_v57 = vmul.f32 %v2550_v37, %v2550_v37 }
 0x14a   :  { %v725_v21 = vrot.slane %v724_v22, 2  ;;  %v730_v33 = vrot.slane %v729_v53, 4  ;;  %v695_v38 = vmul.f32 %v2552_v45, %v2552_v45 }
 0x14b   :  { %v2558_v5 = vadd.f32 %v720_v51, %v719_v25  ;;  %1890 = vrcp.f32 %v790_v50 }
 0x14c   :  { %v726_v26 = vadd.f32 %v725_v21, %v724_v22  ;;  %v731_v18 = vadd.f32 %v730_v33, %v729_v53  ;;  %v736_v27 = vadd.f32 %v696_v57, %v695_v38  ;;  %v2560_v48 = vpop.xlane.xlu0 %677  ;;  %v2562_v3 = vpop.xlane.xlu1 %674 }
 0x14d   :  { %1892 = vrsqrt.f32 %v2558_v5  ;;  %v791_v4 = vadd.f32 1.0, %v2558_v5  ;;  %v698_v12 = vmul.f32 %v2560_v48, %v2560_v48  ;;  %v697_v60 = vmul.f32 %v2562_v3, %v2562_v3 }
 0x14e   :  { %v727_v2 = vrot.slane %v726_v26, 1  ;;  %v732_v62 = vrot.slane %v731_v18, 2  ;;  %v737_v9 = vrot.slane %v736_v27, 4 }
 0x14f   :  { %v743_v8 = vadd.f32 %v698_v12, %v697_v60  ;;  %1894 = vrcp.f32 %v791_v4 }
 0x150   :  { %v2570_v17 = vadd.f32 %v727_v2, %v726_v26  ;;  %v733_v14 = vadd.f32 %v732_v62, %v731_v18  ;;  %v738_v41 = vadd.f32 %v737_v9, %v736_v27  ;;  %v2572_v13 = vpop.xlane.xlu0 %683  ;;  %v2574_v55 = vpop.xlane.xlu1 %680 }
 0x151   :  { %v744_v7 = vrot.slane %v743_v8, 4  ;;  %v700_v20 = vmul.f32 %v2572_v13, %v2572_v13  ;;  %v699_v28 = vmul.f32 %v2574_v55, %v2574_v55 }
 0x152   :  { %v1885_v56 = vpop.eup %1884  ;;  %1896 = vrsqrt.f32 %v2570_v17  ;;  %v792_v43 = vadd.f32 1.0, %v2570_v17  ;;  %v734_v49 = vrot.slane %v733_v14, 1  ;;  %v739_v52 = vrot.slane %v738_v41, 2 }
 0x153   :  { %v765_v25 = vmul.f32 %v1885_v56, %v707_v19  ;;  %v745_v22 = vadd.f32 %v744_v7, %v743_v8  ;;  %v750_v53 = vadd.f32 %v700_v20, %v699_v28 }
 0x154   :  { %1898 = vrcp.f32 %v792_v43  ;;  %v2582_v50 = vadd.f32 %v734_v49, %v733_v14  ;;  %v740_v51 = vadd.f32 %v739_v52, %v738_v41  ;;  %v1887_v57 = vpop.eup %1886 }
 0x155   :  { %v773_v21 = vmul.f32 %v765_v25, %v2512_v29  ;;  %v774_v33 = vmul.f32 %v765_v25, %v2510_v30  ;;  %v746_v38 = vrot.slane %v745_v22, 2  ;;  %v751_v26 = vrot.slane %v750_v53, 4 }
 0x156   :  { %v1889_v18 = vpop.eup %1888  ;;  %1900 = vrsqrt.f32 %v2582_v50  ;;  %v793_v27 = vadd.f32 1.0, %v2582_v50  ;;  %v741_v4 = vrot.slane %v740_v51, 1 }
 0x157   :  { %v805_v19 = vmul.f32 %v1887_v57, %v773_v21  ;;  %v806_v12 = vmul.f32 %v1887_v57, %v774_v33  ;;  %v766_v60 = vmul.f32 %v1889_v18, %v714_v6  ;;  %v747_v2 = vadd.f32 %v746_v38, %v745_v22 }
 0x158   :  { %1902 = vrcp.f32 %v793_v27  ;;  %v2588_v62 = vadd.f32 %v741_v4, %v740_v51  ;;  %v752_v9 = vadd.f32 %v751_v26, %v750_v53  ;;  %v1891_v8 = vpop.eup %1890 }
 0x159   :  { %v821_v29 = vmul.f32 %v805_v19, %v2333_v46  ;;  %v822_v30 = vmul.f32 %v806_v12, %v2283_v23  ;;  %v775_v14 = vmul.f32 %v766_v60, %v2520_v34  ;;  %v776_v41 = vmul.f32 %v766_v60, %v2518_v0 }
 0x15a   :  { %v1893_v7 = vpop.eup %1892  ;;  %1904 = vrsqrt.f32 %v2588_v62  ;;  %v794_v20 = vadd.f32 1.0, %v2588_v62  ;;  %v748_v6 = vrot.slane %v747_v2, 1  ;;  %v753_v28 = vrot.slane %v752_v9, 2 }
 0x15b   :  { %v837_v56 = vsel %vm616_vm0, %v821_v29, 0.0  ;;  %v838_v43 = vsel %vm616_vm0, %v822_v30, 0.0  ;;  %v807_v49 = vmul.f32 %v1891_v8, %v775_v14  ;;  %v808_v52 = vmul.f32 %v1891_v8, %v776_v41 }
 0x15c   :  { %v839_v25 = vadd.f32 %v838_v43, %v837_v56  ;;  %v767_v22 = vmul.f32 %v1893_v7, %v2558_v5  ;;  %v2599_v53 = vadd.f32 %v748_v6, %v747_v2  ;;  %1906 = vrcp.f32 %v794_v20  ;;  %v1895_v57 = vpop.eup %1894 }
 0x15d   :  { %v823_v0 = vmul.f32 %v807_v49, %v3146_v16  ;;  %v824_v34 = vmul.f32 %v808_v52, %v2335_v47  ;;  %v754_v51 = vadd.f32 %v753_v28, %v752_v9 }
 0x15e   :  { %v840_v21 = vrot.slane %v839_v25, 4  ;;  %v777_v33 = vmul.f32 %v767_v22, %v2528_v36  ;;  %v778_v38 = vmul.f32 %v767_v22, %v2526_v31  ;;  %1908 = vrsqrt.f32 %v2599_v53 }
 0x15f   :  { %v1897_v26 = vpop.eup %1896  ;;  %v846_v18 = vsel %vm616_vm0, %v823_v0, 0.0  ;;  %v847_v5 = vsel %vm616_vm0, %v824_v34, 0.0  ;;  %v795_v27 = vadd.f32 1.0, %v2599_v53  ;;  %v755_v4 = vrot.slane %v754_v51, 1 }
 0x160   :  { %v848_v19 = vadd.f32 %v847_v5, %v846_v18  ;;  %v809_v12 = vmul.f32 %v1895_v57, %v777_v33  ;;  %v810_v60 = vmul.f32 %v1895_v57, %v778_v38  ;;  %v768_v2 = vmul.f32 %v1897_v26, %v2570_v17 }
 0x161   :  { %v1899_v9 = vpop.eup %1898  ;;  %1910 = vrcp.f32 %v795_v27  ;;  %v2610_v36 = vadd.f32 %v755_v4, %v754_v51  ;;  %v841_v31 = vadd.f32 %v840_v21, %v839_v25 }
 0x162   :  { %v825_v8 = vmul.f32 %v809_v12, %v3149_v61  ;;  %v826_v29 = vmul.f32 %v810_v60, %v3148_v15  ;;  %v779_v30 = vmul.f32 %v768_v2, %v2536_v11  ;;  %v780_v14 = vmul.f32 %v768_v2, %v2534_v10 }
 0x163   :  { %v1901_v41 = vpop.eup %1900  ;;  %1912 = vrsqrt.f32 %v2610_v36  ;;  %v796_v7 = vadd.f32 1.0, %v2610_v36  ;;  %v842_v20 = vrot.slane %v841_v31, 2  ;;  %v849_v17 = vrot.slane %v848_v19, 4 }
 0x164   :  { %v855_v6 = vsel %vm616_vm0, %v825_v8, 0.0  ;;  %v856_v28 = vsel %vm616_vm0, %v826_v29, 0.0  ;;  %v811_v56 = vmul.f32 %v1899_v9, %v779_v30  ;;  %v812_v43 = vmul.f32 %v1899_v9, %v780_v14 }
 0x165   :  { %v1903_v49 = vpop.eup %1902  ;;  %v857_v52 = vadd.f32 %v856_v28, %v855_v6  ;;  %v769_v25 = vmul.f32 %v1901_v41, %v2582_v50  ;;  %v843_v11 = vadd.f32 %v842_v20, %v841_v31  ;;  %1914 = vrcp.f32 %v796_v7 }
 0x166   :  { %v827_v10 = vmul.f32 %v811_v56, %v2397_v40  ;;  %v828_v22 = vmul.f32 %v812_v43, %v3150_v54  ;;  %v850_v0 = vadd.f32 %v849_v17, %v848_v19 }
 0x167   :  { %v1905_v34 = vpop.eup %1904  ;;  %v781_v51 = vmul.f32 %v769_v25, %v2544_v42  ;;  %v782_v57 = vmul.f32 %v769_v25, %v2542_v1  ;;  %v844_v21 = vrot.slane %v843_v11, 1  ;;  %v858_v33 = vrot.slane %v857_v52, 4 }
 0x168   :  { %v864_v38 = vsel %vm616_vm0, %v827_v10, 0.0  ;;  %v865_v26 = vsel %vm616_vm0, %v828_v22, 0.0  ;;  %v770_v50 = vmul.f32 %v1905_v34, %v2588_v62  ;;  %v851_v18 = vrot.slane %v850_v0, 2 }
 0x169   :  { %v866_v5 = vadd.f32 %v865_v26, %v864_v38  ;;  %v813_v27 = vmul.f32 %v1903_v49, %v781_v51  ;;  %v814_v4 = vmul.f32 %v1903_v49, %v782_v57  ;;  %v2628_v12 = vadd.f32 %v844_v21, %v843_v11  ;;  %v1907_v19 = vpop.eup %1906 }
 0x16a   :  { %v783_v60 = vmul.f32 %v770_v50, %v2552_v45  ;;  %v784_v42 = vmul.f32 %v770_v50, %v2550_v37  ;;  %v852_v1 = vadd.f32 %v851_v18, %v850_v0  ;;  %v859_v2 = vadd.f32 %v858_v33, %v857_v52 }
 0x16b   :  { %v1909_v9 = vpop.eup %1908  ;;  %v867_v31 = vrot.slane %v866_v5, 4  ;;  %v829_v8 = vmul.f32 %v813_v27, %v2453_v39  ;;  %v830_v29 = vmul.f32 %v814_v4, %v2421_v35  ;;  %v917_v62 = vsel %vm616_vm0, %v2628_v12, -inf }
 0x16c   :  { %v815_v30 = vmul.f32 %v1907_v19, %v783_v60  ;;  %v816_v14 = vmul.f32 %v1907_v19, %v784_v42  ;;  %v771_v41 = vmul.f32 %v1909_v9, %v2599_v53  ;;  %918 = vmax.xlane.f32.xlu1 %v917_v62  ;;  %v853_v7 = vrot.slane %v852_v1, 1 }
 0x16d   :  { %v873_v45 = vsel %vm616_vm0, %v829_v8, 0.0  ;;  %v874_v37 = vsel %vm616_vm0, %v830_v29, 0.0  ;;  %v860_v20 = vrot.slane %v859_v2, 2  ;;  %v868_v17 = vadd.f32 %v867_v31, %v866_v5 }
 0x16e   :  { %v1911_v6 = vpop.eup %1910  ;;  %v875_v28 = vadd.f32 %v874_v37, %v873_v45  ;;  %v831_v56 = vmul.f32 %v815_v30, %v2469_v44  ;;  %v832_v43 = vmul.f32 %v816_v14, %v2466_v59  ;;  %v785_v49 = vmul.f32 %v771_v41, %v2562_v3 }
 0x16f   :  { %v786_v52 = vmul.f32 %v771_v41, %v2560_v48  ;;  %v2643_v25 = vadd.f32 %v853_v7, %v852_v1  ;;  %v861_v53 = vadd.f32 %v860_v20, %v859_v2  ;;  %v869_v11 = vrot.slane %v868_v17, 2 }
 0x170   :  { %v1913_v10 = vpop.eup %1912  ;;  %v876_v22 = vrot.slane %v875_v28, 4  ;;  %v882_v0 = vsel %vm616_vm0, %v831_v56, 0.0  ;;  %v883_v34 = vsel %vm616_vm0, %v832_v43, 0.0  ;;  %v817_v51 = vmul.f32 %v1911_v6, %v785_v49 }
 0x171   :  { %v884_v57 = vadd.f32 %v883_v34, %v882_v0  ;;  %v818_v21 = vmul.f32 %v1911_v6, %v786_v52  ;;  %v772_v33 = vmul.f32 %v1913_v10, %v2610_v36  ;;  %v920_v3 = vsel %vm616_vm0, %v2643_v25, -inf }
 0x172   :  { %v833_v48 = vmul.f32 %v817_v51, %v2483_v58  ;;  %921 = vmax.xlane.f32.xlu0 %v920_v3  ;;  %v862_v38 = vrot.slane %v861_v53, 1  ;;  %v870_v26 = vadd.f32 %v869_v11, %v868_v17  ;;  %v877_v50 = vadd.f32 %v876_v22, %v875_v28  ;;  %v1915_v18 = vpop.eup %1914 }
 0x173   :  { %v885_v5 = vrot.slane %v884_v57, 4  ;;  %v834_v27 = vmul.f32 %v818_v21, %v2480_v24  ;;  %v787_v4 = vmul.f32 %v772_v33, %v2574_v55  ;;  %v788_v19 = vmul.f32 %v772_v33, %v2572_v13 }
 0x174   :  { %v891_v60 = vsel %vm616_vm0, %v833_v48, 0.0  ;;  %v2655_v36 = vadd.f32 %v862_v38, %v861_v53  ;;  %v871_v42 = vrot.slane %v870_v26, 1  ;;  %v878_v1 = vrot.slane %v877_v50, 2 }
 0x175   :  { %v892_v2 = vsel %vm616_vm0, %v834_v27, 0.0  ;;  %v819_v9 = vmul.f32 %v1915_v18, %v787_v4  ;;  %v820_v31 = vmul.f32 %v1915_v18, %v788_v19  ;;  %v886_v8 = vadd.f32 %v885_v5, %v884_v57 }
 0x176   :  { %v893_v29 = vadd.f32 %v892_v2, %v891_v60  ;;  %v923_v62 = vsel %vm616_vm0, %v2655_v36, -inf  ;;  %v2660_v30 = vadd.f32 %v871_v42, %v870_v26  ;;  %v879_v55 = vadd.f32 %v878_v1, %v877_v50 }
 0x177   :  { %v835_v13 = vmul.f32 %v819_v9, %v2494_v63  ;;  %v836_v14 = vmul.f32 %v820_v31, %v2492_v32  ;;  %924 = vmax.xlane.f32.xlu1 %v923_v62  ;;  %v887_v41 = vrot.slane %v886_v8, 2 }
 0x178   :  { %v894_v7 = vrot.slane %v893_v29, 4  ;;  %v926_v45 = vsel %vm616_vm0, %v2660_v30, -inf  ;;  %v880_v37 = vrot.slane %v879_v55, 1 }
 0x179   :  { %v900_v20 = vsel %vm616_vm0, %v835_v13, 0.0  ;;  %v901_v17 = vsel %vm616_vm0, %v836_v14, 0.0  ;;  %927 = vmax.xlane.f32.xlu0 %v926_v45  ;;  %v888_v6 = vadd.f32 %v887_v41, %v886_v8 }
 0x17a   :  { %v902_v28 = vadd.f32 %v901_v17, %v900_v20  ;;  %v2668_v56 = vadd.f32 %v880_v37, %v879_v55  ;;  %v895_v43 = vadd.f32 %v894_v7, %v893_v29 }
 0x17b   :  { %v889_v49 = vrot.slane %v888_v6, 1 }
 0x17c   :  { %v903_v52 = vrot.slane %v902_v28, 4  ;;  %v929_v53 = vsel %vm616_vm0, %v2668_v56, -inf  ;;  %v896_v11 = vrot.slane %v895_v43, 2 }
 0x17d   :  { %930 = vmax.xlane.f32.xlu1 %v929_v53  ;;  %v2672_v10 = vadd.f32 %v889_v49, %v888_v6 }
 0x17e   :  { %v897_v22 = vadd.f32 %v896_v11, %v895_v43  ;;  %v904_v0 = vadd.f32 %v903_v52, %v902_v28 }
 0x17f   :  { %v932_v34 = vsel %vm616_vm0, %v2672_v10, -inf }
 0x180   :  { %933 = vmax.xlane.f32.xlu0 %v932_v34  ;;  %v898_v51 = vrot.slane %v897_v22, 1  ;;  %v905_v57 = vrot.slane %v904_v0, 2 }
 0x182   :  { %v2676_v21 = vadd.f32 %v898_v51, %v897_v22  ;;  %v906_v33 = vadd.f32 %v905_v57, %v904_v0 }
 0x184   :  { %v935_v3 = vsel %vm616_vm0, %v2676_v21, -inf  ;;  %v907_v48 = vrot.slane %v906_v33, 1 }
 0x185   :  { %936 = vmax.xlane.f32.xlu1 %v935_v3 }
 0x186   :  { %v2680_v38 = vadd.f32 %v907_v48, %v906_v33 }
 0x188   :  { %3152 = vst [vmem:[#allocation12_spill] sm:$0xff] %v2680_v38  ;;  %v938_v26 = vsel %vm616_vm0, %v2680_v38, -inf }
 0x189   :  { %939 = vmax.xlane.f32.xlu0 %v938_v26 }
 0x1f5   :  { %v919_v50 = vpop.xlane.xlu1 %918 }
 0x1f6   :  { %v941_v18 = vsub.f32 %v2628_v12, %v919_v50 }
 0x1f8   :  { %v949_v5 = vmul.f32 1.442695, %v941_v18 }
 0x1fa   :  { %1916 = vpow2.f32 %v949_v5 }
 0x1fb   :  { %v922_v27 = vpop.xlane.xlu0 %921 }
 0x1fc   :  { %v942_v4 = vsub.f32 %v2643_v25, %v922_v27 }
 0x1fe   :  { %v951_v19 = vmul.f32 1.442695, %v942_v4 }
 0x200   :  { %1918 = vpow2.f32 %v951_v19  ;;  %v925_v60 = vpop.xlane.xlu1 %924 }
 0x201   :  { %v943_v42 = vsub.f32 %v2655_v36, %v925_v60 }
 0x202   :  { %v928_v1 = vpop.xlane.xlu0 %927 }
 0x203   :  { %v953_v2 = vmul.f32 1.442695, %v943_v42  ;;  %v944_v9 = vsub.f32 %v2660_v30, %v928_v1 }
 0x205   :  { %1920 = vpow2.f32 %v953_v2  ;;  %v955_v31 = vmul.f32 1.442695, %v944_v9 }
 0x206   :  { %v931_v8 = vpop.xlane.xlu1 %930 }
 0x207   :  { %v1917_v29 = vpop.eup %1916  ;;  %1922 = vpow2.f32 %v955_v31  ;;  %v945_v62 = vsub.f32 %v2668_v56, %v931_v8 }
 0x208   :  { %v965_v55 = vsel %vm616_vm0, %v1917_v29, 0.0 }
 0x209   :  { %v957_v13 = vmul.f32 1.442695, %v945_v62  ;;  %v934_v14 = vpop.xlane.xlu0 %933  ;;  %966 = vadd.xlane.f32.xlu1 %v965_v55 }
 0x20a   :  { %v946_v41 = vsub.f32 %v2672_v10, %v934_v14 }
 0x20b   :  { %1924 = vpow2.f32 %v957_v13 }
 0x20c   :  { %v959_v7 = vmul.f32 1.442695, %v946_v41 }
 0x20d   :  { %v1919_v45 = vpop.eup %1918 }
 0x20e   :  { %1926 = vpow2.f32 %v959_v7  ;;  %v968_v37 = vsel %vm616_vm0, %v1919_v45, 0.0  ;;  %v937_v20 = vpop.xlane.xlu1 %936 }
 0x20f   :  { %969 = vadd.xlane.f32.xlu0 %v968_v37  ;;  %v947_v17 = vsub.f32 %v2676_v21, %v937_v20 }
 0x211   :  { %v961_v6 = vmul.f32 1.442695, %v947_v17 }
 0x212   :  { %v1921_v28 = vpop.eup %1920  ;;  %v940_v43 = vpop.xlane.xlu0 %939 }
 0x213   :  { %1928 = vpow2.f32 %v961_v6  ;;  %v948_v49 = vsub.f32 %v2680_v38, %v940_v43  ;;  %v971_v52 = vsel %vm616_vm0, %v1921_v28, 0.0 }
 0x214   :  { %v1923_v53 = vpop.eup %1922  ;;  %972 = vadd.xlane.f32.xlu1 %v971_v52 }
 0x215   :  { %v963_v11 = vmul.f32 1.442695, %v948_v49  ;;  %v974_v22 = vsel %vm616_vm0, %v1923_v53, 0.0 }
 0x216   :  { %975 = vadd.xlane.f32.xlu0 %v974_v22 }
 0x217   :  { %1930 = vpow2.f32 %v963_v11 }
 0x218   :  { %v1925_v0 = vpop.eup %1924 }
 0x219   :  { %v977_v34 = vsel %vm616_vm0, %v1925_v0, 0.0 }
 0x21a   :  { %978 = vadd.xlane.f32.xlu1 %v977_v34 }
 0x21b   :  { %v1927_v51 = vpop.eup %1926 }
 0x21c   :  { %v980_v57 = vsel %vm616_vm0, %v1927_v51, 0.0 }
 0x21d   :  { %981 = vadd.xlane.f32.xlu0 %v980_v57 }
 0x220   :  { %v2698_v33 = vpop.eup %1928 }
 0x221   :  { %v983_v3 = vsel %vm616_vm0, %v2698_v33, 0.0 }
 0x222   :  { %984 = vadd.xlane.f32.xlu1 %v983_v3 }
 0x224   :  { %v2702_v48 = vpop.eup %1930 }
 0x225   :  { %v986_v26 = vsel %vm616_vm0, %v2702_v48, 0.0 }
 0x226   :  { %987 = vadd.xlane.f32.xlu0 %v986_v26 }
 0x292   :  { %v967_v50 = vpop.xlane.xlu1 %966 }
 0x293   :  { %1932 = vrcp.f32 %v967_v50 }
 0x298   :  { %v970_v18 = vpop.xlane.xlu0 %969 }
 0x299   :  { %1934 = vrcp.f32 %v970_v18 }
 0x29d   :  { %v973_v5 = vpop.xlane.xlu1 %972 }
 0x29e   :  { %1936 = vrcp.f32 %v973_v5 }
 0x29f   :  { %v976_v27 = vpop.xlane.xlu0 %975 }
 0x2a0   :  { %v1933_v4 = vpop.eup %1932  ;;  %1938 = vrcp.f32 %v976_v27 }
 0x2a1   :  { %v997_v19 = vmul.f32 %v1933_v4, %v1917_v29 }
 0x2a3   :  { %v979_v60 = vpop.xlane.xlu1 %978  ;;  %v1006_v42 = vmul.f32 %v997_v19, %v2283_v23  ;;  %v1005_v1 = vmul.f32 %v997_v19, %v2333_v46 }
 0x2a4   :  { %1940 = vrcp.f32 %v979_v60 }
 0x2a5   :  { %v1024_v2 = vsel %vm616_vm0, %v1006_v42, 0.0  ;;  %v1021_v9 = vsel %vm616_vm0, %v1005_v1, 0.0 }
 0x2a6   :  { %v1935_v31 = vpop.eup %1934  ;;  %v982_v8 = vpop.xlane.xlu0 %981  ;;  %1025 = vadd.xlane.f32.xlu0 %v1024_v2  ;;  %1022 = vadd.xlane.f32.xlu1 %v1021_v9 }
 0x2a7   :  { %1942 = vrcp.f32 %v982_v8  ;;  %v998_v62 = vmul.f32 %v1935_v31, %v1919_v45 }
 0x2a9   :  { %v1008_v55 = vmul.f32 %v998_v62, %v2335_v47  ;;  %v1007_v29 = vmul.f32 %v998_v62, %v3146_v16 }
 0x2ab   :  { %v1937_v13 = vpop.eup %1936  ;;  %v1030_v14 = vsel %vm616_vm0, %v1008_v55, 0.0  ;;  %v1027_v41 = vsel %vm616_vm0, %v1007_v29, 0.0  ;;  %v985_v7 = vpop.xlane.xlu1 %984 }
 0x2ac   :  { %1031 = vadd.xlane.f32.xlu0 %v1030_v14  ;;  %1028 = vadd.xlane.f32.xlu1 %v1027_v41  ;;  %1944 = vrcp.f32 %v985_v7  ;;  %v999_v37 = vmul.f32 %v1937_v13, %v1921_v28 }
 0x2ad   :  { %v1939_v20 = vpop.eup %1938 }
 0x2ae   :  { %v1010_v17 = vmul.f32 %v999_v37, %v3148_v15  ;;  %v1009_v6 = vmul.f32 %v999_v37, %v3149_v61  ;;  %v1000_v45 = vmul.f32 %v1939_v20, %v1923_v53 }
 0x2af   :  { %v988_v43 = vpop.xlane.xlu0 %987 }
 0x2b0   :  { %1946 = vrcp.f32 %v988_v43  ;;  %v1036_v49 = vsel %vm616_vm0, %v1010_v17, 0.0  ;;  %v1033_v52 = vsel %vm616_vm0, %v1009_v6, 0.0  ;;  %v1012_v11 = vmul.f32 %v1000_v45, %v3150_v54 }
 0x2b1   :  { %v1941_v22 = vpop.eup %1940  ;;  %1037 = vadd.xlane.f32.xlu0 %v1036_v49  ;;  %1034 = vadd.xlane.f32.xlu1 %v1033_v52  ;;  %v1011_v34 = vmul.f32 %v1000_v45, %v2397_v40 }
 0x2b2   :  { %v1042_v28 = vsel %vm616_vm0, %v1012_v11, 0.0  ;;  %v1001_v57 = vmul.f32 %v1941_v22, %v1925_v0 }
 0x2b3   :  { %v1039_v3 = vsel %vm616_vm0, %v1011_v34, 0.0 }
 0x2b4   :  { %v1943_v26 = vpop.eup %1942  ;;  %v1014_v53 = vmul.f32 %v1001_v57, %v2421_v35  ;;  %v1013_v50 = vmul.f32 %v1001_v57, %v2453_v39 }
 0x2b5   :  { %1043 = vadd.xlane.f32.xlu0 %v1042_v28  ;;  %1040 = vadd.xlane.f32.xlu1 %v1039_v3  ;;  %v1002_v18 = vmul.f32 %v1943_v26, %v1927_v51 }
 0x2b6   :  { %v1048_v5 = vsel %vm616_vm0, %v1014_v53, 0.0  ;;  %v1045_v27 = vsel %vm616_vm0, %v1013_v50, 0.0 }
 0x2b7   :  { %v1016_v4 = vmul.f32 %v1002_v18, %v2466_v59  ;;  %v1015_v19 = vmul.f32 %v1002_v18, %v2469_v44 }
 0x2b9   :  { %v1945_v60 = vpop.eup %1944  ;;  %1049 = vadd.xlane.f32.xlu0 %v1048_v5  ;;  %1046 = vadd.xlane.f32.xlu1 %v1045_v27  ;;  %v1054_v0 = vsel %vm616_vm0, %v1016_v4, 0.0  ;;  %v1051_v42 = vsel %vm616_vm0, %v1015_v19, 0.0 }
 0x2ba   :  { %v1003_v1 = vmul.f32 %v1945_v60, %v2698_v33 }
 0x2bc   :  { %v1018_v2 = vmul.f32 %v1003_v1, %v2480_v24  ;;  %v1017_v51 = vmul.f32 %v1003_v1, %v2483_v58 }
 0x2bd   :  { %v1947_v9 = vpop.eup %1946  ;;  %1055 = vadd.xlane.f32.xlu0 %v1054_v0  ;;  %1052 = vadd.xlane.f32.xlu1 %v1051_v42 }
 0x2be   :  { %v1060_v31 = vsel %vm616_vm0, %v1018_v2, 0.0  ;;  %v1057_v8 = vsel %vm616_vm0, %v1017_v51, 0.0  ;;  %v1004_v62 = vmul.f32 %v1947_v9, %v2702_v48 }
 0x2c0   :  { %v1020_v55 = vmul.f32 %v1004_v62, %v2492_v32  ;;  %v1019_v29 = vmul.f32 %v1004_v62, %v2494_v63 }
 0x2c1   :  { %1061 = vadd.xlane.f32.xlu0 %v1060_v31  ;;  %1058 = vadd.xlane.f32.xlu1 %v1057_v8 }
 0x2c2   :  { %v1066_v33 = vsel %vm616_vm0, %v1020_v55, 0.0  ;;  %v1063_v13 = vsel %vm616_vm0, %v1019_v29, 0.0 }
 0x2c5   :  { %1067 = vadd.xlane.f32.xlu0 %v1066_v33  ;;  %1064 = vadd.xlane.f32.xlu1 %v1063_v13 }
 0x32f   :  { %v2740_v14 = vpop.xlane.xlu0 %1025  ;;  %v2742_v41 = vpop.xlane.xlu1 %1022 }
 0x330   :  { %v1070_v7 = vmul.f32 %v2740_v14, %v2740_v14  ;;  %v1069_v48 = vmul.f32 %v2742_v41, %v2742_v41 }
 0x332   :  { %v1085_v37 = vadd.f32 %v1070_v7, %v1069_v48 }
 0x334   :  { %v1086_v20 = vrot.slane %v1085_v37, 4 }
 0x335   :  { %v2748_v17 = vpop.xlane.xlu0 %1031  ;;  %v2750_v6 = vpop.xlane.xlu1 %1028 }
 0x336   :  { %v1087_v45 = vadd.f32 %v1086_v20, %v1085_v37  ;;  %v1072_v43 = vmul.f32 %v2748_v17, %v2748_v17  ;;  %v1071_v49 = vmul.f32 %v2750_v6, %v2750_v6 }
 0x338   :  { %v1088_v52 = vrot.slane %v1087_v45, 2  ;;  %v1092_v11 = vadd.f32 %v1072_v43, %v1071_v49 }
 0x33a   :  { %v1089_v22 = vadd.f32 %v1088_v52, %v1087_v45  ;;  %v1093_v34 = vrot.slane %v1092_v11, 4  ;;  %v2756_v28 = vpop.xlane.xlu0 %1037  ;;  %v2758_v57 = vpop.xlane.xlu1 %1034 }
 0x33b   :  { %v1074_v3 = vmul.f32 %v2756_v28, %v2756_v28  ;;  %v1073_v26 = vmul.f32 %v2758_v57, %v2758_v57 }
 0x33c   :  { %v1090_v53 = vrot.slane %v1089_v22, 1  ;;  %v1094_v50 = vadd.f32 %v1093_v34, %v1092_v11 }
 0x33d   :  { %v1099_v18 = vadd.f32 %v1074_v3, %v1073_v26 }
 0x33e   :  { %v1091_v5 = vadd.f32 %v1090_v53, %v1089_v22  ;;  %v1095_v27 = vrot.slane %v1094_v50, 2  ;;  %v2764_v4 = vpop.xlane.xlu0 %1043  ;;  %v2766_v19 = vpop.xlane.xlu1 %1040 }
 0x33f   :  { %v1100_v60 = vrot.slane %v1099_v18, 4  ;;  %v1076_v0 = vmul.f32 %v2764_v4, %v2764_v4  ;;  %v1075_v42 = vmul.f32 %v2766_v19, %v2766_v19 }
 0x340   :  { %1948 = vrsqrt.f32 %v1091_v5  ;;  %v1173_v1 = vadd.f32 1.0, %v1091_v5  ;;  %v1096_v2 = vadd.f32 %v1095_v27, %v1094_v50 }
 0x341   :  { %v1101_v51 = vadd.f32 %v1100_v60, %v1099_v18  ;;  %v1106_v9 = vadd.f32 %v1076_v0, %v1075_v42 }
 0x342   :  { %v1097_v31 = vrot.slane %v1096_v2, 1  ;;  %v2772_v8 = vpop.xlane.xlu0 %1049  ;;  %v2774_v62 = vpop.xlane.xlu1 %1046  ;;  %1950 = vrcp.f32 %v1173_v1 }
 0x343   :  { %v1102_v55 = vrot.slane %v1101_v51, 2  ;;  %v1107_v29 = vrot.slane %v1106_v9, 4  ;;  %v1078_v33 = vmul.f32 %v2772_v8, %v2772_v8  ;;  %v1077_v13 = vmul.f32 %v2774_v62, %v2774_v62 }
 0x344   :  { %v1098_v7 = vadd.f32 %v1097_v31, %v1096_v2 }
 0x345   :  { %v1103_v48 = vadd.f32 %v1102_v55, %v1101_v51  ;;  %v1108_v37 = vadd.f32 %v1107_v29, %v1106_v9  ;;  %v1113_v20 = vadd.f32 %v1078_v33, %v1077_v13 }
 0x346   :  { %1952 = vrsqrt.f32 %v1098_v7  ;;  %v1174_v45 = vadd.f32 1.0, %v1098_v7  ;;  %v2780_v43 = vpop.xlane.xlu0 %1055  ;;  %v2782_v49 = vpop.xlane.xlu1 %1052 }
 0x347   :  { %v1104_v52 = vrot.slane %v1103_v48, 1  ;;  %v1109_v11 = vrot.slane %v1108_v37, 2  ;;  %v1114_v22 = vrot.slane %v1113_v20, 4  ;;  %v1080_v34 = vmul.f32 %v2780_v43, %v2780_v43 }
 0x348   :  { %v1079_v3 = vmul.f32 %v2782_v49, %v2782_v49  ;;  %1954 = vrcp.f32 %v1174_v45 }
 0x349   :  { %v1105_v26 = vadd.f32 %v1104_v52, %v1103_v48  ;;  %v1110_v53 = vadd.f32 %v1109_v11, %v1108_v37  ;;  %v1115_v50 = vadd.f32 %v1114_v22, %v1113_v20 }
 0x34a   :  { %v1120_v18 = vadd.f32 %v1080_v34, %v1079_v3  ;;  %v2788_v27 = vpop.xlane.xlu0 %1061  ;;  %v2790_v60 = vpop.xlane.xlu1 %1058 }
 0x34b   :  { %1956 = vrsqrt.f32 %v1105_v26  ;;  %v1175_v0 = vadd.f32 1.0, %v1105_v26  ;;  %v1111_v42 = vrot.slane %v1110_v53, 1  ;;  %v1116_v1 = vrot.slane %v1115_v50, 2 }
 0x34c   :  { %v1121_v2 = vrot.slane %v1120_v18, 4  ;;  %v1082_v51 = vmul.f32 %v2788_v27, %v2788_v27  ;;  %v1081_v9 = vmul.f32 %v2790_v60, %v2790_v60 }
 0x34d   :  { %v1949_v31 = vpop.eup %1948  ;;  %v2796_v55 = vadd.f32 %v1111_v42, %v1110_v53  ;;  %v1117_v29 = vadd.f32 %v1116_v1, %v1115_v50  ;;  %1958 = vrcp.f32 %v1175_v0 }
 0x34e   :  { %v1149_v33 = vmul.f32 %v1949_v31, %v1091_v5  ;;  %v1122_v13 = vadd.f32 %v1121_v2, %v1120_v18  ;;  %v1127_v48 = vadd.f32 %v1082_v51, %v1081_v9  ;;  %v2798_v37 = vpop.xlane.xlu0 %1067  ;;  %v2800_v20 = vpop.xlane.xlu1 %1064 }
 0x34f   :  { %1960 = vrsqrt.f32 %v2796_v55  ;;  %v1176_v45 = vadd.f32 1.0, %v2796_v55  ;;  %v1118_v52 = vrot.slane %v1117_v29, 1  ;;  %v1084_v11 = vmul.f32 %v2798_v37, %v2798_v37  ;;  %v1951_v53 = vpop.eup %1950 }
 0x350   :  { %v1157_v22 = vmul.f32 %v1149_v33, %v2742_v41  ;;  %v1158_v34 = vmul.f32 %v1149_v33, %v2740_v14  ;;  %v1123_v5 = vrot.slane %v1122_v13, 2  ;;  %v1128_v3 = vrot.slane %v1127_v48, 4 }
 0x351   :  { %1962 = vrcp.f32 %v1176_v45  ;;  %v2808_v50 = vadd.f32 %v1118_v52, %v1117_v29  ;;  %v1083_v18 = vmul.f32 %v2800_v20, %v2800_v20 }
 0x352   :  { %v1189_v0 = vmul.f32 %v1951_v53, %v1157_v22  ;;  %v1190_v42 = vmul.f32 %v1951_v53, %v1158_v34  ;;  %v1124_v1 = vadd.f32 %v1123_v5, %v1122_v13  ;;  %v1129_v2 = vadd.f32 %v1128_v3, %v1127_v48 }
 0x353   :  { %v1953_v51 = vpop.eup %1952  ;;  %1964 = vrsqrt.f32 %v2808_v50  ;;  %v1177_v41 = vadd.f32 1.0, %v2808_v50  ;;  %v1134_v9 = vadd.f32 %v1084_v11, %v1083_v18 }
 0x354   :  { %v1205_v14 = vmul.f32 %v1189_v0, %v2333_v46  ;;  %v1206_v31 = vmul.f32 %v1190_v42, %v2283_v23  ;;  %v1150_v33 = vmul.f32 %v1953_v51, %v1098_v7  ;;  %v1125_v29 = vrot.slane %v1124_v1, 1 }
 0x355   :  { %v1130_v45 = vrot.slane %v1129_v2, 2  ;;  %v1135_v52 = vrot.slane %v1134_v9, 4  ;;  %v1955_v34 = vpop.eup %1954  ;;  %1966 = vrcp.f32 %v1177_v41 }
 0x356   :  { %v1221_v38 = vsel %vm616_vm0, %v1205_v14, 0.0  ;;  %v1222_v22 = vsel %vm616_vm0, %v1206_v31, 0.0  ;;  %v1159_v13 = vmul.f32 %v1150_v33, %v2750_v6  ;;  %v1160_v48 = vmul.f32 %v1150_v33, %v2748_v17 }
 0x357   :  { %v1223_v5 = vadd.f32 %v1222_v22, %v1221_v38  ;;  %v2820_v3 = vadd.f32 %v1125_v29, %v1124_v1  ;;  %v1131_v11 = vadd.f32 %v1130_v45, %v1129_v2  ;;  %v1136_v53 = vadd.f32 %v1135_v52, %v1134_v9 }
 0x358   :  { %v1957_v18 = vpop.eup %1956  ;;  %v1191_v0 = vmul.f32 %v1955_v34, %v1159_v13  ;;  %v1192_v7 = vmul.f32 %v1955_v34, %v1160_v48 }
 0x359   :  { %v1151_v42 = vmul.f32 %v1957_v18, %v1105_v26  ;;  %1968 = vrsqrt.f32 %v2820_v3  ;;  %v1178_v51 = vadd.f32 1.0, %v2820_v3  ;;  %v1132_v14 = vrot.slane %v1131_v11, 1 }
 0x35a   :  { %v1207_v6 = vmul.f32 %v1191_v0, %v3146_v16  ;;  %v1208_v17 = vmul.f32 %v1192_v7, %v2335_v47  ;;  %v1137_v31 = vrot.slane %v1136_v53, 2  ;;  %v1224_v38 = vrot.slane %v1223_v5, 4  ;;  %v1959_v1 = vpop.eup %1958 }
 0x35b   :  { %v1161_v2 = vmul.f32 %v1151_v42, %v2758_v57  ;;  %v1162_v9 = vmul.f32 %v1151_v42, %v2756_v28  ;;  %1970 = vrcp.f32 %v1178_v51  ;;  %v2828_v33 = vadd.f32 %v1132_v14, %v1131_v11 }
 0x35c   :  { %v1961_v26 = vpop.eup %1960  ;;  %v1230_v41 = vsel %vm616_vm0, %v1207_v6, 0.0  ;;  %v1231_v29 = vsel %vm616_vm0, %v1208_v17, 0.0  ;;  %v1138_v45 = vadd.f32 %v1137_v31, %v1136_v53  ;;  %v1225_v52 = vadd.f32 %v1224_v38, %v1223_v5 }
 0x35d   :  { %v1232_v22 = vadd.f32 %v1231_v29, %v1230_v41  ;;  %v1193_v13 = vmul.f32 %v1959_v1, %v1161_v2  ;;  %v1194_v48 = vmul.f32 %v1959_v1, %v1162_v9  ;;  %v1152_v34 = vmul.f32 %v1961_v26, %v2796_v55 }
 0x35e   :  { %v1963_v18 = vpop.eup %1962  ;;  %1972 = vrsqrt.f32 %v2828_v33  ;;  %v1179_v28 = vadd.f32 1.0, %v2828_v33  ;;  %v1139_v57 = vrot.slane %v1138_v45, 1  ;;  %v1226_v11 = vrot.slane %v1225_v52, 2 }
 0x35f   :  { %v1209_v0 = vmul.f32 %v1193_v13, %v3149_v61  ;;  %v1210_v7 = vmul.f32 %v1194_v48, %v3148_v15  ;;  %v1163_v42 = vmul.f32 %v1152_v34, %v2766_v19  ;;  %v1164_v5 = vmul.f32 %v1152_v34, %v2764_v4 }
 0x360   :  { %v1965_v53 = vpop.eup %1964  ;;  %1974 = vrcp.f32 %v1179_v28  ;;  %v2839_v51 = vadd.f32 %v1139_v57, %v1138_v45  ;;  %v1227_v55 = vadd.f32 %v1226_v11, %v1225_v52  ;;  %v1233_v14 = vrot.slane %v1232_v22, 4 }
 0x361   :  { %v1239_v6 = vsel %vm616_vm0, %v1209_v0, 0.0  ;;  %v1240_v17 = vsel %vm616_vm0, %v1210_v7, 0.0  ;;  %v1195_v31 = vmul.f32 %v1963_v18, %v1163_v42  ;;  %v1196_v38 = vmul.f32 %v1963_v18, %v1164_v5 }
 0x362   :  { %v1241_v1 = vadd.f32 %v1240_v17, %v1239_v6  ;;  %v1153_v2 = vmul.f32 %v1965_v53, %v2808_v50  ;;  %1976 = vrsqrt.f32 %v2839_v51  ;;  %v1180_v19 = vadd.f32 1.0, %v2839_v51  ;;  %v1967_v13 = vpop.eup %1966 }
 0x363   :  { %v1211_v4 = vmul.f32 %v1195_v31, %v2397_v40  ;;  %v1212_v9 = vmul.f32 %v1196_v38, %v3150_v54  ;;  %v1228_v26 = vrot.slane %v1227_v55, 1  ;;  %v1234_v41 = vadd.f32 %v1233_v14, %v1232_v22 }
 0x364   :  { %v1165_v29 = vmul.f32 %v1153_v2, %v2774_v62  ;;  %v1166_v45 = vmul.f32 %v1153_v2, %v2772_v8  ;;  %1978 = vrcp.f32 %v1180_v19  ;;  %v1242_v52 = vrot.slane %v1241_v1, 4 }
 0x365   :  { %v1248_v48 = vsel %vm616_vm0, %v1211_v4, 0.0  ;;  %v1249_v50 = vsel %vm616_vm0, %v1212_v9, 0.0  ;;  %v1229_v34 = vadd.f32 %v1228_v26, %v1227_v55  ;;  %v1235_v18 = vrot.slane %v1234_v41, 2 }
 0x366   :  { %v1969_v28 = vpop.eup %1968  ;;  %v1250_v57 = vadd.f32 %v1249_v50, %v1248_v48  ;;  %v1197_v11 = vmul.f32 %v1967_v13, %v1165_v29  ;;  %v1198_v0 = vmul.f32 %v1967_v13, %v1166_v45  ;;  %v1243_v7 = vadd.f32 %v1242_v52, %v1241_v1 }
 0x367   :  { %v1154_v22 = vmul.f32 %v1969_v28, %v2820_v3  ;;  %v2854_v62 = vadd.f32 %v1229_v34, %v2628_v12  ;;  %v1236_v8 = vadd.f32 %v1235_v18, %v1234_v41 }
 0x368   :  { %v1971_v42 = vpop.eup %1970  ;;  %v1213_v5 = vmul.f32 %v1197_v11, %v2453_v39  ;;  %v1214_v53 = vmul.f32 %v1198_v0, %v2421_v35  ;;  %v1244_v14 = vrot.slane %v1243_v7, 2  ;;  %v1251_v6 = vrot.slane %v1250_v57, 4 }
 0x369   :  { %v1167_v55 = vmul.f32 %v1154_v22, %v2782_v49  ;;  %v1168_v17 = vmul.f32 %v1154_v22, %v2780_v43  ;;  %v1301_v31 = vsel %vm616_vm0, %v2854_v62, -inf  ;;  %v1237_v38 = vrot.slane %v1236_v8, 1 }
 0x36a   :  { %v1257_v3 = vsel %vm616_vm0, %v1213_v5, 0.0  ;;  %v1258_v12 = vsel %vm616_vm0, %v1214_v53, 0.0  ;;  %1302 = vmax.xlane.f32.xlu1 %v1301_v31  ;;  %v1245_v1 = vadd.f32 %v1244_v14, %v1243_v7  ;;  %v1252_v2 = vadd.f32 %v1251_v6, %v1250_v57 }
 0x36b   :  { %v1973_v19 = vpop.eup %1972  ;;  %v1259_v4 = vadd.f32 %v1258_v12, %v1257_v3  ;;  %v1199_v9 = vmul.f32 %v1971_v42, %v1167_v55  ;;  %v1200_v26 = vmul.f32 %v1971_v42, %v1168_v17  ;;  %v1238_v41 = vadd.f32 %v1237_v38, %v1236_v8 }
 0x36c   :  { %v1155_v49 = vmul.f32 %v1973_v19, %v2828_v33  ;;  %v1246_v29 = vrot.slane %v1245_v1, 1  ;;  %v1253_v43 = vrot.slane %v1252_v2, 2 }
 0x36d   :  { %v1975_v45 = vpop.eup %1974  ;;  %v1215_v52 = vmul.f32 %v1199_v9, %v2469_v44  ;;  %v1216_v13 = vmul.f32 %v1200_v26, %v2466_v59  ;;  %v2868_v48 = vadd.f32 %v1238_v41, %v2643_v25  ;;  %v1260_v50 = vrot.slane %v1259_v4, 4 }
 0x36e   :  { %v1169_v34 = vmul.f32 %v1155_v49, %v2790_v60  ;;  %v1170_v18 = vmul.f32 %v1155_v49, %v2788_v27  ;;  %v1247_v28 = vadd.f32 %v1246_v29, %v1245_v1  ;;  %v1254_v57 = vadd.f32 %v1253_v43, %v1252_v2 }
 0x36f   :  { %v1977_v11 = vpop.eup %1976  ;;  %v1266_v33 = vsel %vm616_vm0, %v1215_v52, 0.0  ;;  %v1267_v0 = vsel %vm616_vm0, %v1216_v13, 0.0  ;;  %v1304_v7 = vsel %vm616_vm0, %v2868_v48, -inf  ;;  %v1261_v22 = vadd.f32 %v1260_v50, %v1259_v4 }
 0x370   :  { %v1268_v8 = vadd.f32 %v1267_v0, %v1266_v33  ;;  %v1201_v42 = vmul.f32 %v1975_v45, %v1169_v34  ;;  %v1202_v25 = vmul.f32 %v1975_v45, %v1170_v18  ;;  %v1156_v5 = vmul.f32 %v1977_v11, %v2839_v51  ;;  %1305 = vmax.xlane.f32.xlu0 %v1304_v7 }
 0x371   :  { %v1979_v60 = vpop.eup %1978  ;;  %v2878_v27 = vadd.f32 %v1247_v28, %v2655_v36  ;;  %v1255_v53 = vrot.slane %v1254_v57, 1  ;;  %v1262_v14 = vrot.slane %v1261_v22, 2 }
 0x372   :  { %v1217_v6 = vmul.f32 %v1201_v42, %v2483_v58  ;;  %v1218_v55 = vmul.f32 %v1202_v25, %v2480_v24  ;;  %v1171_v17 = vmul.f32 %v1156_v5, %v2800_v20  ;;  %v1172_v31 = vmul.f32 %v1156_v5, %v2798_v37 }
 0x373   :  { %v1307_v38 = vsel %vm616_vm0, %v2878_v27, -inf  ;;  %v1256_v3 = vadd.f32 %v1255_v53, %v1254_v57  ;;  %v1263_v51 = vadd.f32 %v1262_v14, %v1261_v22  ;;  %v1269_v12 = vrot.slane %v1268_v8, 4 }
 0x374   :  { %v1275_v1 = vsel %vm616_vm0, %v1217_v6, 0.0  ;;  %v1276_v36 = vsel %vm616_vm0, %v1218_v55, 0.0  ;;  %v1203_v2 = vmul.f32 %v1979_v60, %v1171_v17  ;;  %v1204_v19 = vmul.f32 %v1979_v60, %v1172_v31  ;;  %1308 = vmax.xlane.f32.xlu1 %v1307_v38  ;;  %v3153_v17 = vld [vmem:[#allocation12_spill] sm:$0xff] }
 0x375   :  { %v1277_v4 = vadd.f32 %v1276_v36, %v1275_v1  ;;  %v1296_v9 = vadd.f32 %v1256_v3, %v2660_v30  ;;  %v1264_v26 = vrot.slane %v1263_v51, 1  ;;  %v1270_v20 = vadd.f32 %v1269_v12, %v1268_v8 }
 0x376   :  { %v1219_v37 = vmul.f32 %v1203_v2, %v2494_v63  ;;  %v1220_v41 = vmul.f32 %v1204_v19, %v2492_v32 }
 0x377   :  { %v1310_v49 = vsel %vm616_vm0, %v1296_v9, -inf  ;;  %v1265_v29 = vadd.f32 %v1264_v26, %v1263_v51  ;;  %v1271_v43 = vrot.slane %v1270_v20, 2  ;;  %v1278_v45 = vrot.slane %v1277_v4, 4 }
 0x378   :  { %v1284_v52 = vsel %vm616_vm0, %v1219_v37, 0.0  ;;  %v1285_v13 = vsel %vm616_vm0, %v1220_v41, 0.0  ;;  %1311 = vmax.xlane.f32.xlu0 %v1310_v49 }
 0x379   :  { %v1286_v50 = vadd.f32 %v1285_v13, %v1284_v52  ;;  %v1297_v34 = vadd.f32 %v1265_v29, %v2668_v56  ;;  %v1272_v30 = vadd.f32 %v1271_v43, %v1270_v20  ;;  %v1279_v18 = vadd.f32 %v1278_v45, %v1277_v4 }
 0x37b   :  { %v1313_v28 = vsel %vm616_vm0, %v1297_v34, -inf  ;;  %v1273_v57 = vrot.slane %v1272_v30, 1  ;;  %v1280_v11 = vrot.slane %v1279_v18, 2  ;;  %v1287_v33 = vrot.slane %v1286_v50, 4 }
 0x37c   :  { %1314 = vmax.xlane.f32.xlu1 %v1313_v28 }
 0x37d   :  { %v1274_v0 = vadd.f32 %v1273_v57, %v1272_v30  ;;  %v1281_v7 = vadd.f32 %v1280_v11, %v1279_v18  ;;  %v1288_v22 = vadd.f32 %v1287_v33, %v1286_v50 }
 0x37f   :  { %v1298_v8 = vadd.f32 %v1274_v0, %v2672_v10  ;;  %v1282_v42 = vrot.slane %v1281_v7, 1  ;;  %v1289_v25 = vrot.slane %v1288_v22, 2 }
 0x381   :  { %v1316_v5 = vsel %vm616_vm0, %v1298_v8, -inf  ;;  %v1283_v60 = vadd.f32 %v1282_v42, %v1281_v7  ;;  %v1290_v53 = vadd.f32 %v1289_v25, %v1288_v22 }
 0x382   :  { %1317 = vmax.xlane.f32.xlu0 %v1316_v5 }
 0x383   :  { %v1299_v56 = vadd.f32 %v1283_v60, %v2676_v21  ;;  %v1291_v14 = vrot.slane %v1290_v53, 1 }
 0x385   :  { %v1319_v6 = vsel %vm616_vm0, %v1299_v56, -inf  ;;  %v1292_v55 = vadd.f32 %v1291_v14, %v1290_v53 }
 0x386   :  { %1320 = vmax.xlane.f32.xlu1 %v1319_v6 }
 0x387   :  { %v1300_v31 = vadd.f32 %v1292_v55, %v3153_v17 }
 0x389   :  { %v1322_v38 = vsel %vm616_vm0, %v1300_v31, -inf }
 0x38a   :  { %1323 = vmax.xlane.f32.xlu0 %v1322_v38 }
 0x3f3   :  { %v1303_v10 = vpop.xlane.xlu1 %1302 }
 0x3f4   :  { %v1325_v3 = vsub.f32 %v2854_v62, %v1303_v10 }
 0x3f6   :  { %v1333_v51 = vmul.f32 1.442695, %v1325_v3 }
 0x3f8   :  { %1980 = vpow2.f32 %v1333_v51 }
 0x3f9   :  { %v1306_v12 = vpop.xlane.xlu0 %1305 }
 0x3fa   :  { %v1326_v1 = vsub.f32 %v2868_v48, %v1306_v12 }
 0x3fc   :  { %v1335_v36 = vmul.f32 1.442695, %v1326_v1 }
 0x3fd   :  { %v1309_v21 = vpop.xlane.xlu1 %1308 }
 0x3fe   :  { %1982 = vpow2.f32 %v1335_v36  ;;  %v1327_v2 = vsub.f32 %v2878_v27, %v1309_v21 }
 0x400   :  { %v1337_v19 = vmul.f32 1.442695, %v1327_v2 }
 0x401   :  { %v1312_v4 = vpop.xlane.xlu0 %1311 }
 0x402   :  { %1984 = vpow2.f32 %v1337_v19  ;;  %v1328_v26 = vsub.f32 %v1296_v9, %v1312_v4 }
 0x404   :  { %v1339_v20 = vmul.f32 1.442695, %v1328_v26 }
 0x405   :  { %v1981_v37 = vpop.eup %1980  ;;  %v1315_v41 = vpop.xlane.xlu1 %1314 }
 0x406   :  { %1986 = vpow2.f32 %v1339_v20  ;;  %v1329_v49 = vsub.f32 %v1297_v34, %v1315_v41  ;;  %v1349_v62 = vsel %vm616_vm0, %v1981_v37, 0.0 }
 0x407   :  { %1350 = vadd.xlane.f32.xlu1 %v1349_v62 }
 0x408   :  { %v1341_v29 = vmul.f32 1.442695, %v1329_v49 }
 0x40a   :  { %1988 = vpow2.f32 %v1341_v29 }
 0x40b   :  { %v1983_v48 = vpop.eup %1982  ;;  %v1318_v43 = vpop.xlane.xlu0 %1317 }
 0x40c   :  { %v1330_v45 = vsub.f32 %v1298_v8, %v1318_v43  ;;  %v1352_v52 = vsel %vm616_vm0, %v1983_v48, 0.0 }
 0x40d   :  { %1353 = vadd.xlane.f32.xlu0 %v1352_v52 }
 0x40e   :  { %v1343_v27 = vmul.f32 1.442695, %v1330_v45 }
 0x40f   :  { %v1985_v13 = vpop.eup %1984  ;;  %v1321_v50 = vpop.xlane.xlu1 %1320 }
 0x410   :  { %1990 = vpow2.f32 %v1343_v27  ;;  %v1331_v9 = vsub.f32 %v1299_v56, %v1321_v50  ;;  %v1355_v30 = vsel %vm616_vm0, %v1985_v13, 0.0 }
 0x411   :  { %1356 = vadd.xlane.f32.xlu1 %v1355_v30 }
 0x412   :  { %v1345_v34 = vmul.f32 1.442695, %v1331_v9 }
 0x413   :  { %v1987_v18 = vpop.eup %1986  ;;  %v1324_v28 = vpop.xlane.xlu0 %1323 }
 0x414   :  { %1992 = vpow2.f32 %v1345_v34  ;;  %v1332_v57 = vsub.f32 %v1300_v31, %v1324_v28  ;;  %v1358_v11 = vsel %vm616_vm0, %v1987_v18, 0.0 }
 0x415   :  { %1359 = vadd.xlane.f32.xlu0 %v1358_v11 }
 0x416   :  { %v1347_v33 = vmul.f32 1.442695, %v1332_v57 }
 0x417   :  { %v1989_v0 = vpop.eup %1988 }
 0x418   :  { %1994 = vpow2.f32 %v1347_v33  ;;  %v1361_v7 = vsel %vm616_vm0, %v1989_v0, 0.0 }
 0x419   :  { %1362 = vadd.xlane.f32.xlu1 %v1361_v7 }
 0x41d   :  { %v2910_v22 = vpop.eup %1990 }
 0x41e   :  { %v1364_v8 = vsel %vm616_vm0, %v2910_v22, 0.0 }
 0x41f   :  { %1365 = vadd.xlane.f32.xlu0 %v1364_v8 }
 0x421   :  { %v2914_v42 = vpop.eup %1992 }
 0x422   :  { %v1367_v25 = vsel %vm616_vm0, %v2914_v42, 0.0 }
 0x423   :  { %1368 = vadd.xlane.f32.xlu1 %v1367_v25 }
 0x425   :  { %v2918_v5 = vpop.eup %1994 }
 0x426   :  { %v1370_v60 = vsel %vm616_vm0, %v2918_v5, 0.0 }
 0x427   :  { %1371 = vadd.xlane.f32.xlu0 %v1370_v60 }
 0x490   :  { %v1351_v53 = vpop.xlane.xlu1 %1350 }
 0x491   :  { %1996 = vrcp.f32 %v1351_v53 }
 0x496   :  { %v1354_v56 = vpop.xlane.xlu0 %1353 }
 0x497   :  { %1998 = vrcp.f32 %v1354_v56 }
 0x49a   :  { %v1357_v14 = vpop.xlane.xlu1 %1356 }
 0x49b   :  { %2000 = vrcp.f32 %v1357_v14 }
 0x49e   :  { %v1997_v6 = vpop.eup %1996  ;;  %v1360_v55 = vpop.xlane.xlu0 %1359 }
 0x49f   :  { %2002 = vrcp.f32 %v1360_v55  ;;  %v1381_v17 = vmul.f32 %v1997_v6, %v1981_v37 }
 0x4a1   :  { %v1390_v31 = vmul.f32 %v1381_v17, %v2283_v23  ;;  %v1389_v38 = vmul.f32 %v1381_v17, %v2333_v46 }
 0x4a2   :  { %v1363_v10 = vpop.xlane.xlu1 %1362 }
 0x4a3   :  { %2004 = vrcp.f32 %v1363_v10  ;;  %v1408_v3 = vsel %vm616_vm0, %v1390_v31, 0.0  ;;  %v1405_v51 = vsel %vm616_vm0, %v1389_v38, 0.0  ;;  %v3155_v38 = vld [vmem:[#allocation8_spill] sm:$0xff] }
 0x4a4   :  { %v1999_v12 = vpop.eup %1998  ;;  %1409 = vadd.xlane.f32.xlu0 %v1408_v3  ;;  %1406 = vadd.xlane.f32.xlu1 %v1405_v51 }
 0x4a5   :  { %v1382_v1 = vmul.f32 %v1999_v12, %v1983_v48 }
 0x4a7   :  { %v1392_v36 = vmul.f32 %v1382_v1, %v2335_v47  ;;  %v1391_v21 = vmul.f32 %v1382_v1, %v3146_v16 }
 0x4a8   :  { %v2001_v2 = vpop.eup %2000  ;;  %v1366_v19 = vpop.xlane.xlu0 %1365 }
 0x4a9   :  { %2006 = vrcp.f32 %v1366_v19  ;;  %v1414_v23 = vsel %vm616_vm0, %v1392_v36, 0.0  ;;  %v1411_v46 = vsel %vm616_vm0, %v1391_v21, 0.0  ;;  %v1383_v4 = vmul.f32 %v2001_v2, %v1985_v13 }
 0x4aa   :  { %1415 = vadd.xlane.f32.xlu0 %v1414_v23  ;;  %1412 = vadd.xlane.f32.xlu1 %v1411_v46 }
 0x4ab   :  { %v1394_v26 = vmul.f32 %v1383_v4, %v3148_v15  ;;  %v1393_v20 = vmul.f32 %v1383_v4, %v3149_v61 }
 0x4ac   :  { %v2003_v37 = vpop.eup %2002  ;;  %v1369_v41 = vpop.xlane.xlu1 %1368 }
 0x4ad   :  { %2008 = vrcp.f32 %v1369_v41  ;;  %v1420_v47 = vsel %vm616_vm0, %v1394_v26, 0.0  ;;  %v1417_v16 = vsel %vm616_vm0, %v1393_v20, 0.0  ;;  %v1384_v49 = vmul.f32 %v2003_v37, %v1987_v18 }
 0x4ae   :  { %1421 = vadd.xlane.f32.xlu0 %v1420_v47  ;;  %1418 = vadd.xlane.f32.xlu1 %v1417_v16 }
 0x4af   :  { %v1396_v62 = vmul.f32 %v1384_v49, %v3150_v54  ;;  %v1395_v29 = vmul.f32 %v1384_v49, %v2397_v40 }
 0x4b0   :  { %v2005_v48 = vpop.eup %2004  ;;  %v1372_v43 = vpop.xlane.xlu0 %1371 }
 0x4b1   :  { %2010 = vrcp.f32 %v1372_v43  ;;  %v1426_v15 = vsel %vm616_vm0, %v1396_v62, 0.0  ;;  %v1423_v61 = vsel %vm616_vm0, %v1395_v29, 0.0  ;;  %v1385_v45 = vmul.f32 %v2005_v48, %v1989_v0 }
 0x4b2   :  { %1427 = vadd.xlane.f32.xlu0 %v1426_v15  ;;  %1424 = vadd.xlane.f32.xlu1 %v1423_v61 }
 0x4b3   :  { %v1398_v52 = vmul.f32 %v1385_v45, %v2421_v35  ;;  %v1397_v27 = vmul.f32 %v1385_v45, %v2453_v39 }
 0x4b5   :  { %v1432_v13 = vsel %vm616_vm0, %v1398_v52, 0.0  ;;  %v1429_v54 = vsel %vm616_vm0, %v1397_v27, 0.0 }
 0x4b6   :  { %v2007_v50 = vpop.eup %2006  ;;  %1433 = vadd.xlane.f32.xlu0 %v1432_v13  ;;  %1430 = vadd.xlane.f32.xlu1 %v1429_v54 }
 0x4b7   :  { %v1386_v40 = vmul.f32 %v2007_v50, %v2910_v22 }
 0x4b9   :  { %v1400_v9 = vmul.f32 %v1386_v40, %v2466_v59  ;;  %v1399_v30 = vmul.f32 %v1386_v40, %v2469_v44 }
 0x4ba   :  { %v2009_v34 = vpop.eup %2008 }
 0x4bb   :  { %v1438_v18 = vsel %vm616_vm0, %v1400_v9, 0.0  ;;  %v1435_v35 = vsel %vm616_vm0, %v1399_v30, 0.0  ;;  %v1387_v39 = vmul.f32 %v2009_v34, %v2914_v42 }
 0x4bc   :  { %1439 = vadd.xlane.f32.xlu0 %v1438_v18  ;;  %1436 = vadd.xlane.f32.xlu1 %v1435_v35 }
 0x4bd   :  { %v1402_v28 = vmul.f32 %v1387_v39, %v2480_v24  ;;  %v1401_v57 = vmul.f32 %v1387_v39, %v2483_v58 }
 0x4be   :  { %v2011_v11 = vpop.eup %2010 }
 0x4bf   :  { %v1444_v33 = vsel %vm616_vm0, %v1402_v28, 0.0  ;;  %v1441_v59 = vsel %vm616_vm0, %v1401_v57, 0.0  ;;  %v1388_v44 = vmul.f32 %v2011_v11, %v2918_v5 }
 0x4c0   :  { %1445 = vadd.xlane.f32.xlu0 %v1444_v33  ;;  %1442 = vadd.xlane.f32.xlu1 %v1441_v59 }
 0x4c1   :  { %v1404_v0 = vmul.f32 %v1388_v44, %v2492_v32  ;;  %v1403_v7 = vmul.f32 %v1388_v44, %v2494_v63  ;;  %v3154_v32 = vlaneseq }
 0x4c3   :  { %v1450_v22 = vsel %vm616_vm0, %v1404_v0, 0.0  ;;  %v1447_v8 = vsel %vm616_vm0, %v1403_v7, 0.0  ;;  %v1486_v63 = vand.u32 127, %v3154_v32 }
 0x4c4   :  { %1451 = vadd.xlane.f32.xlu0 %v1450_v22  ;;  %1448 = vadd.xlane.f32.xlu1 %v1447_v8 }
 0x4c5   :  { %v1491_v14 = vadd.s32 4294967288, %v1486_v63  ;;  %v2986_v3 = vsub.s32 %v1486_v63, %v3155_v38 }
 0x4c7   :  { %v2983_v10 = vsub.s32 %v1491_v14, %v3155_v38 }
 0x52d   :  { %v2957_v24 = vpop.xlane.xlu0 %1409  ;;  %v2959_v58 = vpop.xlane.xlu1 %1406 }
 0x52e   :  { %v1454_v1 = vmul.f32 %v2957_v24, %v2957_v24  ;;  %v1453_v36 = vmul.f32 %v2959_v58, %v2959_v58 }
 0x530   :  { %v1495_v49 = vrot.slane %v1454_v1, %v2983_v10  ;;  %v1490_v62 = vrot.slane %v1453_v36, %v2986_v3 }
 0x532   :  { %v1497_v9 = vsel %vm1496_vm1, %v1495_v49, %v1490_v62 }
 0x533   :  { %v2961_v42 = vpop.xlane.xlu0 %1415  ;;  %v2963_v25 = vpop.xlane.xlu1 %1412 }
 0x534   :  { %v1456_v17 = vmul.f32 %v2961_v42, %v2961_v42  ;;  %v1455_v31 = vmul.f32 %v2963_v25, %v2963_v25 }
 0x536   :  { %v1505_v19 = vrot.slane %v1456_v17, %v2983_v10  ;;  %v1501_v23 = vrot.slane %v1455_v31, %v2986_v3 }
 0x537   :  { %v2965_v5 = vpop.xlane.xlu0 %1421  ;;  %v2967_v60 = vpop.xlane.xlu1 %1418 }
 0x538   :  { %v1458_v51 = vmul.f32 %v2965_v5, %v2965_v5  ;;  %v1457_v12 = vmul.f32 %v2967_v60, %v2967_v60  ;;  %v1506_v43 = vsel %vm1496_vm1, %v1505_v19, %v1501_v23  ;;  %v1601_v19 = vsub.s32 4, %v3155_v38 }
 0x539   :  { %v1562_v35 = vsel %vm1561_vm2, %v1506_v43, %v1497_v9  ;;  %v1593_v43 = vsub.s32 2, %v3155_v38 }
 0x53a   :  { %v1514_v47 = vrot.slane %v1458_v51, %v2983_v10  ;;  %v1510_v16 = vrot.slane %v1457_v12, %v2986_v3  ;;  %v2065_v12 = vmov 0  }
 0x53b   :  { %v2970_v53 = vpop.xlane.xlu0 %1427  ;;  %v2972_v56 = vpop.xlane.xlu1 %1424  ;;  %1881 = vset.pattern.permute.xlu1 %v2065_v12  ;;  %1880 = vset.pattern.permute.xlu0 %v2065_v12 }
 0x53c   :  { %v1460_v21 = vmul.f32 %v2970_v53, %v2970_v53  ;;  %v1459_v2 = vmul.f32 %v2972_v56, %v2972_v56  ;;  %v1515_v40 = vsel %vm1496_vm1, %v1514_v47, %v1510_v16 }
 0x53d   :  { %v1564_v11 = vsel %vm1563_vm3, %v1515_v40, %v1562_v35 }
 0x53e   :  { %v1523_v29 = vrot.slane %v1460_v21, %v2983_v10  ;;  %v1519_v48 = vrot.slane %v1459_v2, %v2986_v3  ;;  %v1589_v21 = vsub.s32 1, %v3155_v38 }
 0x53f   :  { %v2974_v6 = vpop.xlane.xlu0 %1433  ;;  %v2976_v55 = vpop.xlane.xlu1 %1430 }
 0x540   :  { %v1462_v46 = vmul.f32 %v2974_v6, %v2974_v6  ;;  %v1461_v4 = vmul.f32 %v2976_v55, %v2976_v55  ;;  %v1524_v30 = vsel %vm1496_vm1, %v1523_v29, %v1519_v48 }
 0x541   :  { %v1566_v7 = vsel %vm1565_vm4, %v1524_v30, %v1564_v11 }
 0x542   :  { %v1532_v15 = vrot.slane %v1462_v46, %v2983_v10  ;;  %v1528_v61 = vrot.slane %v1461_v4, %v2986_v3  ;;  %v1605_v4 = vsub.s32 5, %v3155_v38 }
 0x544   :  { %v1533_v39 = vsel %vm1496_vm1, %v1532_v15, %v1528_v61  ;;  %v1609_v15 = vsub.s32 6, %v3155_v38 }
 0x545   :  { %v3006_v26 = vpop.xlane.xlu0 %1439  ;;  %v3008_v20 = vpop.xlane.xlu1 %1436  ;;  %v1568_v32 = vsel %vm1567_vm5, %v1533_v39, %v1566_v7 }
 0x546   :  { %v1464_v37 = vmul.f32 %v3006_v26, %v3006_v26  ;;  %v1463_v41 = vmul.f32 %v3008_v20, %v3008_v20 }
 0x548   :  { %v1541_v27 = vrot.slane %v1464_v37, %v2983_v10  ;;  %v1537_v13 = vrot.slane %v1463_v41, %v2986_v3  ;;  %v3156_v37 = vld [vmem:[#allocation9_spill] sm:$0xff] }
 0x549   :  { %v3023_v45 = vpop.xlane.xlu0 %1445  ;;  %v3025_v52 = vpop.xlane.xlu1 %1442 }
 0x54a   :  { %v1466_v54 = vmul.f32 %v3023_v45, %v3023_v45  ;;  %v1465_v50 = vmul.f32 %v3025_v52, %v3025_v52  ;;  %v1542_v44 = vsel %vm1496_vm1, %v1541_v27, %v1537_v13 }
 0x54b   :  { %v1570_v63 = vsel %vm1569_vm6, %v1542_v44, %v1568_v32 }
 0x54c   :  { %v1550_v34 = vrot.slane %v1466_v54, %v2983_v10  ;;  %v1546_v18 = vrot.slane %v1465_v50, %v2986_v3 }
 0x54d   :  { %v3040_v28 = vpop.xlane.xlu0 %1451  ;;  %v3042_v57 = vpop.xlane.xlu1 %1448 }
 0x54e   :  { %v1468_v33 = vmul.f32 %v3040_v28, %v3040_v28  ;;  %v1467_v59 = vmul.f32 %v3042_v57, %v3042_v57  ;;  %v1551_v0 = vsel %vm1496_vm1, %v1550_v34, %v1546_v18 }
 0x54f   :  { %v1572_v17 = vsel %vm1571_vm7, %v1551_v0, %v1570_v63 }
 0x550   :  { %v1559_v22 = vrot.slane %v1468_v33, %v2983_v10  ;;  %v1555_v8 = vrot.slane %v1467_v59, %v2986_v3 }
 0x552   :  { %v1560_v14 = vsel %vm1496_vm1, %v1559_v22, %v1555_v8 }
 0x553   :  { %v1574_v31 = vsel %vm1573_vm8, %v1560_v14, %v1572_v17 }
 0x554   :  { %v1577_v51 = vsel %vm1576_vm9, %v1574_v31, 0.0 }
 0x555   :  { %1578 = vadd.xlane.f32.xlu1 %v1577_v51 }
 0x5de   :  { %v1579_v1 = vpop.xlane.xlu1 %1578 }
 0x5df   :  { %2012 = vrsqrt.f32 %v1579_v1  ;;  %v1639_v36 = vadd.f32 1.0, %v1579_v1 }
 0x5e1   :  { %2014 = vrcp.f32 %v1639_v36 }
 0x5ec   :  { %v2013_v2 = vpop.eup %2012 }
 0x5ed   :  { %v1581_v23 = vmul.f32 %v2013_v2, %v1579_v1 }
 0x5ee   :  { %v2015_v46 = vpop.eup %2014 }
 0x5ef   :  { %v1586_v41 = vrot.slane %v1581_v23, %v3156_v37  ;;  %v1590_v47 = vrot.slane %v1581_v23, %v1589_v21  ;;  %v1602_v16 = vrot.slane %v1581_v23, %v1601_v19  ;;  %v1645_v62 = vrot.slane %v2015_v46, %v3156_v37 }
 0x5f0   :  { %v1606_v48 = vrot.slane %v1581_v23, %v1605_v4  ;;  %v1649_v50 = vrot.slane %v2015_v46, %v1589_v21  ;;  %v1661_v40 = vrot.slane %v2015_v46, %v1601_v19  ;;  %v1594_v18 = vrot.slane %v1581_v23, %v1593_v43 }
 0x5f1   :  { %v1624_v49 = vmul.f32 %v1586_v41, %v2957_v24  ;;  %v1623_v29 = vmul.f32 %v1586_v41, %v2959_v58  ;;  %v1625_v13 = vmul.f32 %v1590_v47, %v2963_v25  ;;  %v1632_v54 = vmul.f32 %v1602_v16, %v2974_v6 }
 0x5f2   :  { %v1626_v24 = vmul.f32 %v1590_v47, %v2961_v42  ;;  %v1634_v9 = vmul.f32 %v1606_v48, %v3006_v26  ;;  %v1613_v58 = vsub.s32 7, %v3155_v38  ;;  %v1610_v35 = vrot.slane %v1581_v23, %v1609_v15 }
 0x5f3   :  { %v1683_v61 = vmul.f32 %v1645_v62, %v1624_v49  ;;  %v1682_v27 = vmul.f32 %v1645_v62, %v1623_v29  ;;  %v1684_v30 = vmul.f32 %v1649_v50, %v1625_v13  ;;  %v1691_v34 = vmul.f32 %v1661_v40, %v1632_v54 }
 0x5f4   :  { %v1665_v39 = vrot.slane %v2015_v46, %v1605_v4  ;;  %v1685_v25 = vmul.f32 %v1649_v50, %v1626_v24  ;;  %v1597_v6 = vsub.s32 3, %v3155_v38  ;;  %v1627_v33 = vmul.f32 %v1594_v18, %v2967_v60 }
 0x5f5   :  { %1718 = vperm.xlu1 %1881, %v1683_v61   ;;  %1715 = vperm.xlu0 %1880, %v1682_v27   ;;  %v1636_v59 = vmul.f32 %v1610_v35, %v3023_v45  ;;  %v1614_v42 = vrot.slane %v1581_v23, %v1613_v58  ;;  %v1653_v26 = vrot.slane %v2015_v46, %v1593_v43 }
 0x5f6   :  { %v1693_v11 = vmul.f32 %v1665_v39, %v1634_v9  ;;  %v1669_v44 = vrot.slane %v2015_v46, %v1609_v15  ;;  %v1628_v0 = vmul.f32 %v1594_v18, %v2965_v5  ;;  %v1598_v32 = vrot.slane %v1581_v23, %v1597_v6 }
 0x5f7   :  { %v1686_v7 = vmul.f32 %v1653_v26, %v1627_v33  ;;  %v1638_v8 = vmul.f32 %v1614_v42, %v3040_v28  ;;  %v1673_v38 = vrot.slane %v2015_v46, %v1613_v58  ;;  %v1657_v45 = vrot.slane %v2015_v46, %v1597_v6 }
 0x5f8   :  { %v1695_v22 = vmul.f32 %v1669_v44, %v1636_v59  ;;  %v1687_v63 = vmul.f32 %v1653_v26, %v1628_v0  ;;  %v1629_v60 = vmul.f32 %v1598_v32, %v2972_v56  ;;  %v1630_v31 = vmul.f32 %v1598_v32, %v2970_v53 }
 0x5f9   :  { %1721 = vperm.xlu1 %1881, %v1684_v30   ;;  %1742 = vperm.xlu0 %1880, %v1691_v34   ;;  %v1697_v14 = vmul.f32 %v1673_v38, %v1638_v8  ;;  %v1631_v51 = vmul.f32 %v1602_v16, %v2976_v55  ;;  %v1633_v12 = vmul.f32 %v1606_v48, %v3008_v20 }
 0x5fa   :  { %v1688_v17 = vmul.f32 %v1657_v45, %v1629_v60  ;;  %v1689_v5 = vmul.f32 %v1657_v45, %v1630_v31  ;;  %v1635_v36 = vmul.f32 %v1610_v35, %v3025_v52  ;;  %v1637_v21 = vmul.f32 %v1614_v42, %v3042_v57 }
 0x5fb   :  { %v1690_v28 = vmul.f32 %v1661_v40, %v1631_v51  ;;  %v1692_v1 = vmul.f32 %v1665_v39, %v1633_v12 }
 0x5fc   :  { %v1694_v56 = vmul.f32 %v1669_v44, %v1635_v36  ;;  %v1696_v2 = vmul.f32 %v1673_v38, %v1637_v21 }
 0x5fd   :  { %1724 = vperm.xlu1 %1881, %v1685_v25   ;;  %1748 = vperm.xlu0 %1880, %v1693_v11  }
 0x601   :  { %1727 = vperm.xlu1 %1881, %v1686_v7   ;;  %1754 = vperm.xlu0 %1880, %v1695_v22  }
 0x605   :  { %1730 = vperm.xlu1 %1881, %v1687_v63   ;;  %1760 = vperm.xlu0 %1880, %v1697_v14  }
 0x609   :  { %1733 = vperm.xlu1 %1881, %v1688_v17  }
 0x60d   :  { %1736 = vperm.xlu1 %1881, %v1689_v5  }
 0x611   :  { %1739 = vperm.xlu1 %1881, %v1690_v28  }
 0x615   :  { %1745 = vperm.xlu1 %1881, %v1692_v1  }
 0x619   :  { %1751 = vperm.xlu1 %1881, %v1694_v56  }
 0x61d   :  { %1757 = vperm.xlu1 %1881, %v1696_v2  }
 0x670   :  { %v1719_v53 = vpop.permute.xlu1 %1718  ;;  %v1716_v55 = vpop.permute.xlu0 %1715 }
 0x671   :  { %v1769_v29 = vrot.slane %v1719_v53, %v2983_v10  ;;  %v1765_v48 = vrot.slane %v1716_v55, %v2986_v3 }
 0x673   :  { %v1770_v58 = vsel %vm1496_vm1, %v1769_v29, %v1765_v48 }
 0x674   :  { %v1722_v19 = vpop.permute.xlu1 %1721  ;;  %v1743_v37 = vpop.permute.xlu0 %1742 }
 0x675   :  { %v1774_v43 = vrot.slane %v1722_v19, %v2986_v3  ;;  %v1805_v40 = vrot.slane %v1743_v37, %v2983_v10 }
 0x678   :  { %v1725_v23 = vpop.permute.xlu1 %1724  ;;  %v1749_v47 = vpop.permute.xlu0 %1748 }
 0x679   :  { %v1778_v52 = vrot.slane %v1725_v23, %v2983_v10  ;;  %v1814_v30 = vrot.slane %v1749_v47, %v2983_v10 }
 0x67b   :  { %v1779_v13 = vsel %vm1496_vm1, %v1778_v52, %v1774_v43 }
 0x67c   :  { %v1728_v46 = vpop.permute.xlu1 %1727  ;;  %v1755_v49 = vpop.permute.xlu0 %1754  ;;  %v1834_v35 = vsel %vm1561_vm2, %v1779_v13, %v1770_v58 }
 0x67d   :  { %v1783_v61 = vrot.slane %v1728_v46, %v2986_v3  ;;  %v1823_v39 = vrot.slane %v1755_v49, %v2983_v10 }
 0x680   :  { %v1731_v4 = vpop.permute.xlu1 %1730  ;;  %v1761_v25 = vpop.permute.xlu0 %1760 }
 0x681   :  { %v1787_v62 = vrot.slane %v1731_v4, %v2983_v10  ;;  %v1832_v44 = vrot.slane %v1761_v25, %v2983_v10 }
 0x683   :  { %v1788_v24 = vsel %vm1496_vm1, %v1787_v62, %v1783_v61 }
 0x684   :  { %v1734_v41 = vpop.permute.xlu1 %1733  ;;  %v1835_v11 = vsel %vm1563_vm3, %v1788_v24, %v1834_v35 }
 0x685   :  { %v1792_v54 = vrot.slane %v1734_v41, %v2986_v3 }
 0x688   :  { %v1737_v20 = vpop.permute.xlu1 %1736 }
 0x689   :  { %v1796_v15 = vrot.slane %v1737_v20, %v2983_v10 }
 0x68b   :  { %v1797_v34 = vsel %vm1496_vm1, %v1796_v15, %v1792_v54 }
 0x68c   :  { %v1740_v16 = vpop.permute.xlu1 %1739  ;;  %v1836_v59 = vsel %vm1565_vm4, %v1797_v34, %v1835_v11 }
 0x68d   :  { %v1801_v27 = vrot.slane %v1740_v16, %v2986_v3 }
 0x68f   :  { %v1806_v6 = vsel %vm1496_vm1, %v1805_v40, %v1801_v27 }
 0x690   :  { %v1746_v57 = vpop.permute.xlu1 %1745  ;;  %v1837_v0 = vsel %vm1567_vm5, %v1806_v6, %v1836_v59 }
 0x691   :  { %v1810_v50 = vrot.slane %v1746_v57, %v2986_v3 }
 0x693   :  { %v1815_v33 = vsel %vm1496_vm1, %v1814_v30, %v1810_v50 }
 0x694   :  { %v1752_v9 = vpop.permute.xlu1 %1751  ;;  %v1838_v22 = vsel %vm1569_vm6, %v1815_v33, %v1837_v0 }
 0x695   :  { %v1819_v18 = vrot.slane %v1752_v9, %v2986_v3 }
 0x697   :  { %v1824_v42 = vsel %vm1496_vm1, %v1823_v39, %v1819_v18 }
 0x698   :  { %v1758_v26 = vpop.permute.xlu1 %1757  ;;  %v1839_v32 = vsel %vm1571_vm7, %v1824_v42, %v1838_v22 }
 0x699   :  { %v1828_v7 = vrot.slane %v1758_v26, %v2986_v3 }
 0x69b   :  { %v1833_v8 = vsel %vm1496_vm1, %v1832_v44, %v1828_v7 }
 0x69c   :  { %v1840_v38 = vsel %vm1573_vm8, %v1833_v8, %v1839_v32 }
 0x69d   :  { %1842 = vst.msk [vmem:[#allocation5] sm:$0xff] %vm1576_vm9, %v1840_v38 }
 0x69e   :  { %2047 = shalt.err (!%p2044_p9)
}
 0x69f   :  { %1852 = dma.vmem_to_hbm [thread:$0]  %s1850_s3, 128, %s3122_s2, [#allocation4]  }
 0x6a0   :  { %2058 = dma.done.wait [#allocation4], 128  }
 0x6a1   :  { %2059 = vsyncadd [#allocation4], 4294967168 }
 0x6a2   :  { %1856 = vsyncpa [#allocation3], 1 }
 0x6a3   :  { %1857 = vsyncpa [#allocation4], 1 }

</bundles_post_ra>
